<compile_context>
chip_gen: v7x
topology: tpu7x:2x2x1
jax: 0.10.0
libtpu: 0.0.40
codegen_flags: <defaults>
</compile_context>

<pallas_src>
import functools

import jax
import jax.numpy as jnp
from jax import lax
from jax.experimental import pallas as pl
from jax.experimental.pallas import tpu as pltpu


def _round_up(a, m):
    return (a + m - 1) // m * m


def _mod_const(a, k):
    """a % k for non-negative int32 vectors (bitwise AND when k is a power of 2)."""
    if k & (k - 1) == 0:
        return jnp.bitwise_and(a, k - 1)
    return a % k


def _div_const(a, k):
    """a // k for non-negative int32 vectors (shift when k is a power of 2)."""
    if k & (k - 1) == 0:
        return jnp.right_shift(a, k.bit_length() - 1)
    return a // k


def _vmem_limit_bytes():
    """Per-generation scoped-VMEM limit (96 MiB on 128-MiB chips, 40 MiB on v7x)."""
    try:
        cap = int(pltpu.get_tpu_info().vmem_capacity_bytes)
    except Exception:
        return 48 * 1024 * 1024
    if cap >= 100 * 1024 * 1024:          # v5e / v6e: 128 MiB physical
        return 96 * 1024 * 1024
    return max(32 * 1024 * 1024,          # v7x: 64 MiB physical -> 40 MiB scoped
               min(40 * 1024 * 1024, cap * 5 // 8))


def _choose_d_tile(D, HW, Cin, Cg, Cmid, mm_itemsize, budget_bytes):
    """Largest D-tile (divisor of D, lane-dense output) whose per-step VMEM fits."""
    valid = [dt for dt in range(D, 0, -1)
             if D % dt == 0 and (dt == D or (dt * HW) % 128 == 0)]
    for dt in valid:                       # descending: prefer big tiles
        mt = dt * HW
        est = (4 * 2 * Cin * mt * 4                       # a/prev/next/out, 2x buffered
               + Cg * (dt + 2) * HW * mm_itemsize         # halo window scratch
               + 2 * 9 * Cg * mt * mm_itemsize            # double-buffered patch
               + Cmid * mt * 4)                           # f32 accumulator
        if est <= budget_bytes:
            return dt
    return valid[-1]                       # smallest valid; may still exceed budget


def _resblock_kernel(a_ref, prev_ref, next_ref, w1_ref, b1_ref, w2_ref, b2_ref,
                     o_ref, win_ref, patch_ref, acc_ref,
                     *, D_TILE, H, W, Cin, Cg, matmul_dtype):
    # a_ref    : (Cin, Mt)        this D tile (Mt = D_TILE*H*W), f32
    # prev_ref : (Cin, Mt)        previous D tile (clamped at the boundary)
    # next_ref : (Cin, Mt)        next D tile (clamped at the boundary)
    # w1_ref   : (3, Cmid, 9*Cg)  3x3x3 weights, per-kd chunks, K=(kh,kw,ci_pad)
    # b1_ref   : (Cmid, 1)        f32
    # w2_ref   : (Cin, Cmid)      1x1x1 weights
    # b2_ref   : (Cin, 1)         f32
    # o_ref    : (Cin, Mt)        f32
    # win_ref  : (Cg, (D_TILE+2)*HW)   bf16/f32 halo window scratch
    # patch_ref: (2, 9*Cg, Mt)         double-buffered im2col chunk scratch
    # acc_ref  : (Cmid, Mt)            f32 conv-1 accumulator
    HW = H * W
    Mt = D_TILE * HW
    Wlen = (D_TILE + 2) * HW
    t = pl.program_id(1)
    n_t = pl.num_programs(1)

    # ---- assemble the halo window in matmul_dtype (one cast, before taps) ----
    prev_scale = jnp.where(t > 0, 1.0, 0.0).astype(jnp.float32)
    next_scale = jnp.where(t < n_t - 1, 1.0, 0.0).astype(jnp.float32)
    act_main = jnp.maximum(a_ref[...], 0.0).astype(matmul_dtype)
    act_prev = (jnp.maximum(prev_ref[:, (D_TILE - 1) * HW:], 0.0)
                * prev_scale).astype(matmul_dtype)          # last plane of prev tile
    act_next = (jnp.maximum(next_ref[:, :HW], 0.0)
                * next_scale).astype(matmul_dtype)           # first plane of next tile
    win_ref[:Cin, :HW] = act_prev
    win_ref[:Cin, HW:(D_TILE + 1) * HW] = act_main
    win_ref[:Cin, (D_TILE + 1) * HW:] = act_next
    if Cg > Cin:                                             # sublane pad rows -> 0
        win_ref[Cin:, :] = jnp.zeros((Cg - Cin, Wlen), matmul_dtype)
    win = win_ref[...]

    # ---- spatial validity masks (h/w only; D boundary handled by halo zeros) ----
    j = lax.broadcasted_iota(jnp.int32, (1, Mt), 1)
    q = _mod_const(j, HW)
    h_i = _div_const(q, W)
    w_i = _mod_const(q, W)
    masks = {}
    for kh in range(3):
        dh = kh - 1
        ok_h = jnp.logical_and(h_i + dh >= 0, h_i + dh < H)
        for kw in range(3):
            dw = kw - 1
            masks[(kh, kw)] = jnp.logical_and(
                ok_h, jnp.logical_and(w_i + dw >= 0, w_i + dw < W))

    # ---- im2col in 3 chunks of 9 taps, each consumed by an accumulating dot ----
    for kd in range(3):
        slot = kd & 1                               # double-buffer: no WAR serialization
        for kh in range(3):
            for kw in range(3):
                off = (kd - 1) * HW + (kh - 1) * W + (kw - 1)
                shift = (-(HW + off)) % Wlen        # rolled[j] == win[j + HW + off]
                rolled = win if shift == 0 else pltpu.roll(win, shift, 1)
                val = rolled[:, :Mt]
                tap = kh * 3 + kw
                patch_ref[slot, tap * Cg:(tap + 1) * Cg, :] = jnp.where(
                    masks[(kh, kw)], val, jnp.zeros_like(val))
        contrib = jnp.dot(w1_ref[kd], patch_ref[slot],
                          preferred_element_type=jnp.float32)
        if kd == 0:
            acc_ref[...] = contrib
        else:
            acc_ref[...] += contrib

    # ---- bias + ReLU, 1x1x1 conv (channel matmul), bias, residual --------------
    hmid = jnp.maximum(acc_ref[...] + b1_ref[...], 0.0)
    y = jnp.dot(w2_ref[...], hmid.astype(matmul_dtype),
                preferred_element_type=jnp.float32)
    # Residual re-read from VMEM (cheap vld) instead of keeping x live throughout.
    o_ref[...] = y + b2_ref[...] + a_ref[...]


@functools.partial(jax.jit, static_argnames=("matmul_dtype", "d_tile"))
def resblock_forward(x_ncdhw, w1, b1, w2, b2, *,
                     matmul_dtype=jnp.bfloat16, d_tile=None):
    """ResBlock forward.

    x_ncdhw : (N, Cin, D, H, W) f32  (PyTorch NCDHW layout)
    w1      : (Cmid, Cin, 3, 3, 3)   torch Conv3d(in, mid, 3) weight (OIDHW)
    b1      : (Cmid,)
    w2      : (Cin, Cmid)            torch Conv3d(mid, in, 1) weight (squeezed)
    b2      : (Cin,)
    """
    N, Cin, D, H, W = x_ncdhw.shape
    Cmid = w1.shape[0]
    HW = H * W
    M = D * HW
    mm_itemsize = jnp.dtype(matmul_dtype).itemsize
    sub = 16 if mm_itemsize == 2 else 8
    Cg = _round_up(Cin, sub)                 # sublane-aligned per-tap row group

    vmem_limit = _vmem_limit_bytes()
    if d_tile is None:
        d_tile = _choose_d_tile(D, HW, Cin, Cg, Cmid, mm_itemsize, vmem_limit // 2)
    assert D % d_tile == 0 and (d_tile == D or (d_tile * HW) % 128 == 0), d_tile
    n_dt = D // d_tile
    Mt = d_tile * HW

    # Contiguous reshape only — no transpose / pad HBM passes on the input.
    x3 = x_ncdhw.reshape(N, Cin, M)

    # (Cmid, Cin, 3,3,3) -> (3[kd], Cmid, 9*Cg); K ordered (kh, kw, ci), channel
    # dim zero-padded to Cg so it matches the padded patch rows.  Tiny, done once.
    w1t = jnp.transpose(w1, (2, 0, 3, 4, 1))                     # (kd, o, kh, kw, i)
    w1t = jnp.pad(w1t, ((0, 0), (0, 0), (0, 0), (0, 0), (0, Cg - Cin)))
    w1m = w1t.reshape(3, Cmid, 9 * Cg).astype(matmul_dtype)
    w2m = w2.astype(matmul_dtype)

    kernel = functools.partial(_resblock_kernel, D_TILE=d_tile, H=H, W=W,
                               Cin=Cin, Cg=Cg, matmul_dtype=matmul_dtype)

    cost = pl.CostEstimate(
        flops=2 * N * M * Cmid * (27 * Cg + Cin),
        transcendentals=0,
        bytes_accessed=(4 * N * Cin * M * 4                 # 3x input reads + output
                        + (w1m.size + w2m.size) * mm_itemsize
                        + (b1.size + b2.size) * 4),
    )

    tile_blk = (pl.Squeezed(), Cin, Mt)
    in_specs = [
        pl.BlockSpec(tile_blk, lambda b, t: (b, 0, t)),                       # this tile
        pl.BlockSpec(tile_blk, lambda b, t: (b, 0, jnp.maximum(t - 1, 0))),   # prev tile
        pl.BlockSpec(tile_blk, lambda b, t: (b, 0, jnp.minimum(t + 1, n_dt - 1))),  # next
        pl.BlockSpec((3, Cmid, 9 * Cg), lambda b, t: (0, 0, 0)),
        pl.BlockSpec((Cmid, 1), lambda b, t: (0, 0)),
        pl.BlockSpec((Cin, Cmid), lambda b, t: (0, 0)),
        pl.BlockSpec((Cin, 1), lambda b, t: (0, 0)),
    ]

    out = pl.pallas_call(
        kernel,
        out_shape=jax.ShapeDtypeStruct((N, Cin, M), jnp.float32),
        grid_spec=pltpu.PrefetchScalarGridSpec(
            num_scalar_prefetch=0,
            grid=(N, n_dt),
            in_specs=in_specs,
            out_specs=pl.BlockSpec(tile_blk, lambda b, t: (b, 0, t)),
            scratch_shapes=[
                pltpu.VMEM((Cg, (d_tile + 2) * HW), matmul_dtype),  # halo window
                pltpu.VMEM((2, 9 * Cg, Mt), matmul_dtype),          # im2col chunks (2x)
                pltpu.VMEM((Cmid, Mt), jnp.float32),                # conv-1 accumulator
            ]),
        compiler_params=pltpu.CompilerParams(
            dimension_semantics=("parallel", "parallel"),
            vmem_limit_bytes=vmem_limit),
        cost_estimate=cost,
    )(x3, x3, x3, w1m, b1.reshape(Cmid, 1), w2m, b2.reshape(Cin, 1))

    return out.reshape(N, Cin, D, H, W)


def _xavier_uniform(key, shape, fan_in, fan_out):
    a = (6.0 / (fan_in + fan_out)) ** 0.5
    return jax.random.uniform(key, shape, jnp.float32, -a, a)


def make_params(key, in_channel, channel):
    """Deterministic params matching the torch init (xavier weights, zero bias)."""
    k1, k2 = jax.random.split(key)
    # nn.Conv3d(in_channel, channel, 3): weight (channel, in_channel, 3, 3, 3).
    w1 = _xavier_uniform(k1, (channel, in_channel, 3, 3, 3),
                         fan_in=in_channel * 27, fan_out=channel * 27)
    b1 = jnp.zeros((channel,), jnp.float32)
    # nn.Conv3d(channel, in_channel, 1): weight (in_channel, channel, 1, 1, 1).
    w2 = _xavier_uniform(k2, (in_channel, channel),
                         fan_in=channel, fan_out=in_channel)
    b2 = jnp.zeros((in_channel,), jnp.float32)
    return w1, b1, w2, b2


def resblock_reference(x, w1, b1, w2, b2):
    """Pure-XLA f32 reference in NCDHW (matches the torch forward)."""
    Cin, Cmid = w2.shape
    h = jax.nn.relu(x)
    y = lax.conv_general_dilated(
        h, w1, window_strides=(1, 1, 1),
        padding=((1, 1), (1, 1), (1, 1)),
        dimension_numbers=("NCDHW", "OIDHW", "NCDHW"))
    y = jax.nn.relu(y + b1.reshape(1, -1, 1, 1, 1))
    y = lax.conv_general_dilated(
        y, w2.reshape(Cin, Cmid, 1, 1, 1), window_strides=(1, 1, 1),
        padding="VALID",
        dimension_numbers=("NCDHW", "OIDHW", "NCDHW"))
    y = y + b2.reshape(1, -1, 1, 1, 1)
    return y + x


if __name__ == "__main__":
    N, Cin, Cmid, D, H, W = 2, 4, 8, 8, 8, 8

    key = jax.random.PRNGKey(0)
    kx, kp, kb = jax.random.split(key, 3)
    x = jax.random.normal(kx, (N, Cin, D, H, W), jnp.float32)
    w1, b1, w2, b2 = make_params(kp, Cin, Cmid)
    # Non-zero biases (still deterministic) to exercise the bias path in tests.
    kb1, kb2 = jax.random.split(kb)
    b1 = 0.1 * jax.random.normal(kb1, (Cmid,), jnp.float32)
    b2 = 0.1 * jax.random.normal(kb2, (Cin,), jnp.float32)

    ref = resblock_reference(x, w1, b1, w2, b2)

    # Exact-math configuration (f32 MXU operands): tight check.  Exercise the
    # auto single-tile path and the halo-exchange D-tiled paths.
    for dtile in (None, 4, 2):
        out_f32 = jax.block_until_ready(
            resblock_forward(x, w1, b1, w2, b2,
                             matmul_dtype=jnp.float32, d_tile=dtile))
        assert out_f32.shape == ref.shape == (N, Cin, D, H, W)
        err = float(jnp.max(jnp.abs(out_f32 - ref)))
        assert err < 1e-4, (dtile, err)

    # Default performance configuration (bf16 MXU operands, f32 accumulation):
    # looser tolerance accounts for bf16 operand rounding.
    out_bf16 = jax.block_until_ready(resblock_forward(x, w1, b1, w2, b2))
    assert float(jnp.max(jnp.abs(out_bf16 - ref))) < 5e-2
    out_bf16_t = jax.block_until_ready(
        resblock_forward(x, w1, b1, w2, b2, d_tile=2))
    assert float(jnp.max(jnp.abs(out_bf16_t - ref))) < 5e-2

    print("KERNEL_OK")
</pallas_src>

<mosaic_0001>
module attributes {stable_mosaic.version = 11 : i64} {
  func.func @_resblock_kernel(%arg0: i32, %arg1: i32, %arg2: memref<1x4x512xf32, #tpu.memory_space<vmem>>, %arg3: memref<1x4x512xf32, #tpu.memory_space<vmem>>, %arg4: memref<1x4x512xf32, #tpu.memory_space<vmem>>, %arg5: memref<3x8x72xf32, #tpu.memory_space<vmem>>, %arg6: memref<8x1xf32, #tpu.memory_space<vmem>>, %arg7: memref<4x8xf32, #tpu.memory_space<vmem>>, %arg8: memref<4x1xf32, #tpu.memory_space<vmem>>, %arg9: memref<1x4x512xf32, #tpu.memory_space<vmem>>, %arg10: memref<8x640xf32, #tpu.memory_space<vmem>>, %arg11: memref<2x72x512xf32, #tpu.memory_space<vmem>>, %arg12: memref<8x512xf32, #tpu.memory_space<vmem>>) attributes {dimension_semantics = [#tpu.dimension_semantics<parallel>, #tpu.dimension_semantics<parallel>], iteration_bounds = array<i64: 2, 1>, scalar_prefetch = 0 : i64, scratch_operands = 3 : i64, tpu.core_type = #tpu.core_type<tc>, window_params = [{transform_indices = @transform_0, window_bounds = array<i64: 1, 4, 512>}, {transform_indices = @transform_1, window_bounds = array<i64: 1, 4, 512>}, {transform_indices = @transform_2, window_bounds = array<i64: 1, 4, 512>}, {pipeline_mode = #tpu.pipeline_mode<synchronous>, transform_indices = @transform_3, window_bounds = array<i64: 3, 8, 72>}, {pipeline_mode = #tpu.pipeline_mode<synchronous>, transform_indices = @transform_4, window_bounds = array<i64: 8, 1>}, {pipeline_mode = #tpu.pipeline_mode<synchronous>, transform_indices = @transform_5, window_bounds = array<i64: 4, 8>}, {pipeline_mode = #tpu.pipeline_mode<synchronous>, transform_indices = @transform_6, window_bounds = array<i64: 4, 1>}, {transform_indices = @transform_7, window_bounds = array<i64: 1, 4, 512>}]} {
    %c0_i32 = arith.constant 0 : i32
    %0 = arith.cmpi sgt, %arg1, %c0_i32 : i32
    %cst = arith.constant 1.000000e+00 : f32
    %cst_0 = arith.constant 0.000000e+00 : f32
    %1 = arith.select %0, %cst, %cst_0 : f32
    %c0_i32_1 = arith.constant 0 : i32
    %2 = arith.cmpi slt, %arg1, %c0_i32_1 : i32
    %cst_2 = arith.constant 1.000000e+00 : f32
    %cst_3 = arith.constant 0.000000e+00 : f32
    %3 = arith.select %2, %cst_2, %cst_3 : f32
    %c0 = arith.constant 0 : index
    %c0_4 = arith.constant 0 : index
    %c0_5 = arith.constant 0 : index
    %4 = vector.load %arg2[%c0, %c0_4, %c0_5] : memref<1x4x512xf32, #tpu.memory_space<vmem>>, vector<1x4x512xf32>
    %5 = vector.shape_cast %4 : vector<1x4x512xf32> to vector<4x512xf32>
    %cst_6 = arith.constant 0.000000e+00 : f32
    %6 = vector.broadcast %cst_6 : f32 to vector<4x512xf32>
    %7 = arith.maximumf %5, %6 : vector<4x512xf32>
    %c0_7 = arith.constant 0 : index
    %c0_8 = arith.constant 0 : index
    %c448 = arith.constant 448 : index
    %8 = vector.load %arg3[%c0_7, %c0_8, %c448] : memref<1x4x512xf32, #tpu.memory_space<vmem>>, vector<1x4x64xf32>
    %9 = vector.shape_cast %8 : vector<1x4x64xf32> to vector<4x64xf32>
    %cst_9 = arith.constant 0.000000e+00 : f32
    %10 = vector.broadcast %cst_9 : f32 to vector<4x64xf32>
    %11 = arith.maximumf %9, %10 : vector<4x64xf32>
    %12 = vector.broadcast %1 : f32 to vector<4x64xf32>
    %13 = arith.mulf %11, %12 : vector<4x64xf32>
    %c0_10 = arith.constant 0 : index
    %c0_11 = arith.constant 0 : index
    %c0_12 = arith.constant 0 : index
    %14 = vector.load %arg4[%c0_10, %c0_11, %c0_12] : memref<1x4x512xf32, #tpu.memory_space<vmem>>, vector<1x4x64xf32>
    %15 = vector.shape_cast %14 : vector<1x4x64xf32> to vector<4x64xf32>
    %cst_13 = arith.constant 0.000000e+00 : f32
    %16 = vector.broadcast %cst_13 : f32 to vector<4x64xf32>
    %17 = arith.maximumf %15, %16 : vector<4x64xf32>
    %18 = vector.broadcast %3 : f32 to vector<4x64xf32>
    %19 = arith.mulf %17, %18 : vector<4x64xf32>
    %c0_14 = arith.constant 0 : index
    %c0_15 = arith.constant 0 : index
    %20 = vector.load %arg10[%c0_14, %c0_15] : memref<8x640xf32, #tpu.memory_space<vmem>>, vector<4x64xf32>
    tpu.vector_store %arg10[%c0_14, %c0_15], %13 {strides = array<i32>} : memref<8x640xf32, #tpu.memory_space<vmem>>, vector<4x64xf32>,
    %c0_16 = arith.constant 0 : index
    %c64 = arith.constant 64 : index
    %21 = vector.load %arg10[%c0_16, %c64] : memref<8x640xf32, #tpu.memory_space<vmem>>, vector<4x512xf32>
    tpu.vector_store %arg10[%c0_16, %c64], %7 {strides = array<i32>} : memref<8x640xf32, #tpu.memory_space<vmem>>, vector<4x512xf32>,
    %c0_17 = arith.constant 0 : index
    %c576 = arith.constant 576 : index
    %22 = vector.load %arg10[%c0_17, %c576] : memref<8x640xf32, #tpu.memory_space<vmem>>, vector<4x64xf32>
    tpu.vector_store %arg10[%c0_17, %c576], %19 {strides = array<i32>} : memref<8x640xf32, #tpu.memory_space<vmem>>, vector<4x64xf32>,
    %cst_18 = arith.constant 0.000000e+00 : f32
    %23 = vector.broadcast %cst_18 : f32 to vector<4x640xf32>
    %c4 = arith.constant 4 : index
    %c0_19 = arith.constant 0 : index
    %24 = vector.load %arg10[%c4, %c0_19] : memref<8x640xf32, #tpu.memory_space<vmem>>, vector<4x640xf32>
    tpu.vector_store %arg10[%c4, %c0_19], %23 {strides = array<i32>} : memref<8x640xf32, #tpu.memory_space<vmem>>, vector<4x640xf32>,
    %c0_20 = arith.constant 0 : index
    %c0_21 = arith.constant 0 : index
    %25 = vector.load %arg10[%c0_20, %c0_21] : memref<8x640xf32, #tpu.memory_space<vmem>>, vector<8x640xf32>
    %26 = tpu.iota {dimensions = array<i32: 1>} : vector<1x512xi32>
    %c63_i32 = arith.constant 63 : i32
    %27 = vector.broadcast %c63_i32 : i32 to vector<1x512xi32>
    %28 = arith.andi %26, %27 : vector<1x512xi32>
    %c3_i32 = arith.constant 3 : i32
    %29 = vector.broadcast %c3_i32 : i32 to vector<1x512xi32>
    %30 = arith.shrsi %28, %29 : vector<1x512xi32>
    %c7_i32 = arith.constant 7 : i32
    %31 = vector.broadcast %c7_i32 : i32 to vector<1x512xi32>
    %32 = arith.andi %28, %31 : vector<1x512xi32>
    %c-1_i32 = arith.constant -1 : i32
    %33 = vector.broadcast %c-1_i32 : i32 to vector<1x512xi32>
    %34 = arith.addi %30, %33 : vector<1x512xi32>
    %c0_i32_22 = arith.constant 0 : i32
    %35 = vector.broadcast %c0_i32_22 : i32 to vector<1x512xi32>
    %36 = arith.cmpi sge, %34, %35 : vector<1x512xi32>
    %c-1_i32_23 = arith.constant -1 : i32
    %37 = vector.broadcast %c-1_i32_23 : i32 to vector<1x512xi32>
    %38 = arith.addi %30, %37 : vector<1x512xi32>
    %c8_i32 = arith.constant 8 : i32
    %39 = vector.broadcast %c8_i32 : i32 to vector<1x512xi32>
    %40 = arith.cmpi slt, %38, %39 : vector<1x512xi32>
    %41 = arith.andi %36, %40 : vector<1x512xi1>
    %c-1_i32_24 = arith.constant -1 : i32
    %42 = vector.broadcast %c-1_i32_24 : i32 to vector<1x512xi32>
    %43 = arith.addi %32, %42 : vector<1x512xi32>
    %c0_i32_25 = arith.constant 0 : i32
    %44 = vector.broadcast %c0_i32_25 : i32 to vector<1x512xi32>
    %45 = arith.cmpi sge, %43, %44 : vector<1x512xi32>
    %c-1_i32_26 = arith.constant -1 : i32
    %46 = vector.broadcast %c-1_i32_26 : i32 to vector<1x512xi32>
    %47 = arith.addi %32, %46 : vector<1x512xi32>
    %c8_i32_27 = arith.constant 8 : i32
    %48 = vector.broadcast %c8_i32_27 : i32 to vector<1x512xi32>
    %49 = arith.cmpi slt, %47, %48 : vector<1x512xi32>
    %50 = arith.andi %45, %49 : vector<1x512xi1>
    %51 = arith.andi %41, %50 : vector<1x512xi1>
    %c0_i32_28 = arith.constant 0 : i32
    %52 = vector.broadcast %c0_i32_28 : i32 to vector<1x512xi32>
    %53 = arith.addi %32, %52 : vector<1x512xi32>
    %c0_i32_29 = arith.constant 0 : i32
    %54 = vector.broadcast %c0_i32_29 : i32 to vector<1x512xi32>
    %55 = arith.cmpi sge, %53, %54 : vector<1x512xi32>
    %c0_i32_30 = arith.constant 0 : i32
    %56 = vector.broadcast %c0_i32_30 : i32 to vector<1x512xi32>
    %57 = arith.addi %32, %56 : vector<1x512xi32>
    %c8_i32_31 = arith.constant 8 : i32
    %58 = vector.broadcast %c8_i32_31 : i32 to vector<1x512xi32>
    %59 = arith.cmpi slt, %57, %58 : vector<1x512xi32>
    %60 = arith.andi %55, %59 : vector<1x512xi1>
    %61 = arith.andi %41, %60 : vector<1x512xi1>
    %c1_i32 = arith.constant 1 : i32
    %62 = vector.broadcast %c1_i32 : i32 to vector<1x512xi32>
    %63 = arith.addi %32, %62 : vector<1x512xi32>
    %c0_i32_32 = arith.constant 0 : i32
    %64 = vector.broadcast %c0_i32_32 : i32 to vector<1x512xi32>
    %65 = arith.cmpi sge, %63, %64 : vector<1x512xi32>
    %c1_i32_33 = arith.constant 1 : i32
    %66 = vector.broadcast %c1_i32_33 : i32 to vector<1x512xi32>
    %67 = arith.addi %32, %66 : vector<1x512xi32>
    %c8_i32_34 = arith.constant 8 : i32
    %68 = vector.broadcast %c8_i32_34 : i32 to vector<1x512xi32>
    %69 = arith.cmpi slt, %67, %68 : vector<1x512xi32>
    %70 = arith.andi %65, %69 : vector<1x512xi1>
    %71 = arith.andi %41, %70 : vector<1x512xi1>
    %c0_i32_35 = arith.constant 0 : i32
    %72 = vector.broadcast %c0_i32_35 : i32 to vector<1x512xi32>
    %73 = arith.addi %30, %72 : vector<1x512xi32>
    %c0_i32_36 = arith.constant 0 : i32
    %74 = vector.broadcast %c0_i32_36 : i32 to vector<1x512xi32>
    %75 = arith.cmpi sge, %73, %74 : vector<1x512xi32>
    %c0_i32_37 = arith.constant 0 : i32
    %76 = vector.broadcast %c0_i32_37 : i32 to vector<1x512xi32>
    %77 = arith.addi %30, %76 : vector<1x512xi32>
    %c8_i32_38 = arith.constant 8 : i32
    %78 = vector.broadcast %c8_i32_38 : i32 to vector<1x512xi32>
    %79 = arith.cmpi slt, %77, %78 : vector<1x512xi32>
    %80 = arith.andi %75, %79 : vector<1x512xi1>
    %c-1_i32_39 = arith.constant -1 : i32
    %81 = vector.broadcast %c-1_i32_39 : i32 to vector<1x512xi32>
    %82 = arith.addi %32, %81 : vector<1x512xi32>
    %c0_i32_40 = arith.constant 0 : i32
    %83 = vector.broadcast %c0_i32_40 : i32 to vector<1x512xi32>
    %84 = arith.cmpi sge, %82, %83 : vector<1x512xi32>
    %c-1_i32_41 = arith.constant -1 : i32
    %85 = vector.broadcast %c-1_i32_41 : i32 to vector<1x512xi32>
    %86 = arith.addi %32, %85 : vector<1x512xi32>
    %c8_i32_42 = arith.constant 8 : i32
    %87 = vector.broadcast %c8_i32_42 : i32 to vector<1x512xi32>
    %88 = arith.cmpi slt, %86, %87 : vector<1x512xi32>
    %89 = arith.andi %84, %88 : vector<1x512xi1>
    %90 = arith.andi %80, %89 : vector<1x512xi1>
    %c0_i32_43 = arith.constant 0 : i32
    %91 = vector.broadcast %c0_i32_43 : i32 to vector<1x512xi32>
    %92 = arith.addi %32, %91 : vector<1x512xi32>
    %c0_i32_44 = arith.constant 0 : i32
    %93 = vector.broadcast %c0_i32_44 : i32 to vector<1x512xi32>
    %94 = arith.cmpi sge, %92, %93 : vector<1x512xi32>
    %c0_i32_45 = arith.constant 0 : i32
    %95 = vector.broadcast %c0_i32_45 : i32 to vector<1x512xi32>
    %96 = arith.addi %32, %95 : vector<1x512xi32>
    %c8_i32_46 = arith.constant 8 : i32
    %97 = vector.broadcast %c8_i32_46 : i32 to vector<1x512xi32>
    %98 = arith.cmpi slt, %96, %97 : vector<1x512xi32>
    %99 = arith.andi %94, %98 : vector<1x512xi1>
    %100 = arith.andi %80, %99 : vector<1x512xi1>
    %c1_i32_47 = arith.constant 1 : i32
    %101 = vector.broadcast %c1_i32_47 : i32 to vector<1x512xi32>
    %102 = arith.addi %32, %101 : vector<1x512xi32>
    %c0_i32_48 = arith.constant 0 : i32
    %103 = vector.broadcast %c0_i32_48 : i32 to vector<1x512xi32>
    %104 = arith.cmpi sge, %102, %103 : vector<1x512xi32>
    %c1_i32_49 = arith.constant 1 : i32
    %105 = vector.broadcast %c1_i32_49 : i32 to vector<1x512xi32>
    %106 = arith.addi %32, %105 : vector<1x512xi32>
    %c8_i32_50 = arith.constant 8 : i32
    %107 = vector.broadcast %c8_i32_50 : i32 to vector<1x512xi32>
    %108 = arith.cmpi slt, %106, %107 : vector<1x512xi32>
    %109 = arith.andi %104, %108 : vector<1x512xi1>
    %110 = arith.andi %80, %109 : vector<1x512xi1>
    %c1_i32_51 = arith.constant 1 : i32
    %111 = vector.broadcast %c1_i32_51 : i32 to vector<1x512xi32>
    %112 = arith.addi %30, %111 : vector<1x512xi32>
    %c0_i32_52 = arith.constant 0 : i32
    %113 = vector.broadcast %c0_i32_52 : i32 to vector<1x512xi32>
    %114 = arith.cmpi sge, %112, %113 : vector<1x512xi32>
    %c1_i32_53 = arith.constant 1 : i32
    %115 = vector.broadcast %c1_i32_53 : i32 to vector<1x512xi32>
    %116 = arith.addi %30, %115 : vector<1x512xi32>
    %c8_i32_54 = arith.constant 8 : i32
    %117 = vector.broadcast %c8_i32_54 : i32 to vector<1x512xi32>
    %118 = arith.cmpi slt, %116, %117 : vector<1x512xi32>
    %119 = arith.andi %114, %118 : vector<1x512xi1>
    %c-1_i32_55 = arith.constant -1 : i32
    %120 = vector.broadcast %c-1_i32_55 : i32 to vector<1x512xi32>
    %121 = arith.addi %32, %120 : vector<1x512xi32>
    %c0_i32_56 = arith.constant 0 : i32
    %122 = vector.broadcast %c0_i32_56 : i32 to vector<1x512xi32>
    %123 = arith.cmpi sge, %121, %122 : vector<1x512xi32>
    %c-1_i32_57 = arith.constant -1 : i32
    %124 = vector.broadcast %c-1_i32_57 : i32 to vector<1x512xi32>
    %125 = arith.addi %32, %124 : vector<1x512xi32>
    %c8_i32_58 = arith.constant 8 : i32
    %126 = vector.broadcast %c8_i32_58 : i32 to vector<1x512xi32>
    %127 = arith.cmpi slt, %125, %126 : vector<1x512xi32>
    %128 = arith.andi %123, %127 : vector<1x512xi1>
    %129 = arith.andi %119, %128 : vector<1x512xi1>
    %c0_i32_59 = arith.constant 0 : i32
    %130 = vector.broadcast %c0_i32_59 : i32 to vector<1x512xi32>
    %131 = arith.addi %32, %130 : vector<1x512xi32>
    %c0_i32_60 = arith.constant 0 : i32
    %132 = vector.broadcast %c0_i32_60 : i32 to vector<1x512xi32>
    %133 = arith.cmpi sge, %131, %132 : vector<1x512xi32>
    %c0_i32_61 = arith.constant 0 : i32
    %134 = vector.broadcast %c0_i32_61 : i32 to vector<1x512xi32>
    %135 = arith.addi %32, %134 : vector<1x512xi32>
    %c8_i32_62 = arith.constant 8 : i32
    %136 = vector.broadcast %c8_i32_62 : i32 to vector<1x512xi32>
    %137 = arith.cmpi slt, %135, %136 : vector<1x512xi32>
    %138 = arith.andi %133, %137 : vector<1x512xi1>
    %139 = arith.andi %119, %138 : vector<1x512xi1>
    %c1_i32_63 = arith.constant 1 : i32
    %140 = vector.broadcast %c1_i32_63 : i32 to vector<1x512xi32>
    %141 = arith.addi %32, %140 : vector<1x512xi32>
    %c0_i32_64 = arith.constant 0 : i32
    %142 = vector.broadcast %c0_i32_64 : i32 to vector<1x512xi32>
    %143 = arith.cmpi sge, %141, %142 : vector<1x512xi32>
    %c1_i32_65 = arith.constant 1 : i32
    %144 = vector.broadcast %c1_i32_65 : i32 to vector<1x512xi32>
    %145 = arith.addi %32, %144 : vector<1x512xi32>
    %c8_i32_66 = arith.constant 8 : i32
    %146 = vector.broadcast %c8_i32_66 : i32 to vector<1x512xi32>
    %147 = arith.cmpi slt, %145, %146 : vector<1x512xi32>
    %148 = arith.andi %143, %147 : vector<1x512xi1>
    %149 = arith.andi %119, %148 : vector<1x512xi1>
    %c9_i32 = arith.constant 9 : i32
    %150 = tpu.dynamic_rotate %25 by %c9_i32 dim 1 : vector<8x640xf32>, i32 -> vector<8x640xf32>
    %151 = vector.extract_strided_slice %150 {offsets = [0, 0], sizes = [8, 512], strides = [1, 1]} : vector<8x640xf32> to vector<8x512xf32>
    %cst_67 = arith.constant 0.000000e+00 : f32
    %152 = vector.broadcast %cst_67 : f32 to vector<8x512xf32>
    %153 = vector.shape_cast %51 : vector<1x512xi1> to vector<1x512xi1>
    %154 = vector.broadcast %153 : vector<1x512xi1> to vector<8x512xi1>
    %155 = arith.select %154, %151, %152 : vector<8x512xi1>, vector<8x512xf32>
    %c0_68 = arith.constant 0 : index
    %c0_69 = arith.constant 0 : index
    %c0_70 = arith.constant 0 : index
    %156 = vector.load %arg11[%c0_68, %c0_69, %c0_70] : memref<2x72x512xf32, #tpu.memory_space<vmem>>, vector<1x8x512xf32>
    %157 = vector.shape_cast %156 : vector<1x8x512xf32> to vector<8x512xf32>
    %158 = vector.shape_cast %155 : vector<8x512xf32> to vector<1x8x512xf32>
    tpu.vector_store %arg11[%c0_68, %c0_69, %c0_70], %158 {strides = array<i32>} : memref<2x72x512xf32, #tpu.memory_space<vmem>>, vector<1x8x512xf32>,
    %c8_i32_71 = arith.constant 8 : i32
    %159 = tpu.dynamic_rotate %25 by %c8_i32_71 dim 1 : vector<8x640xf32>, i32 -> vector<8x640xf32>
    %160 = vector.extract_strided_slice %159 {offsets = [0, 0], sizes = [8, 512], strides = [1, 1]} : vector<8x640xf32> to vector<8x512xf32>
    %cst_72 = arith.constant 0.000000e+00 : f32
    %161 = vector.broadcast %cst_72 : f32 to vector<8x512xf32>
    %162 = vector.shape_cast %61 : vector<1x512xi1> to vector<1x512xi1>
    %163 = vector.broadcast %162 : vector<1x512xi1> to vector<8x512xi1>
    %164 = arith.select %163, %160, %161 : vector<8x512xi1>, vector<8x512xf32>
    %c0_73 = arith.constant 0 : index
    %c8 = arith.constant 8 : index
    %c0_74 = arith.constant 0 : index
    %165 = vector.load %arg11[%c0_73, %c8, %c0_74] : memref<2x72x512xf32, #tpu.memory_space<vmem>>, vector<1x8x512xf32>
    %166 = vector.shape_cast %165 : vector<1x8x512xf32> to vector<8x512xf32>
    %167 = vector.shape_cast %164 : vector<8x512xf32> to vector<1x8x512xf32>
    tpu.vector_store %arg11[%c0_73, %c8, %c0_74], %167 {strides = array<i32>} : memref<2x72x512xf32, #tpu.memory_space<vmem>>, vector<1x8x512xf32>,
    %c7_i32_75 = arith.constant 7 : i32
    %168 = tpu.dynamic_rotate %25 by %c7_i32_75 dim 1 : vector<8x640xf32>, i32 -> vector<8x640xf32>
    %169 = vector.extract_strided_slice %168 {offsets = [0, 0], sizes = [8, 512], strides = [1, 1]} : vector<8x640xf32> to vector<8x512xf32>
    %cst_76 = arith.constant 0.000000e+00 : f32
    %170 = vector.broadcast %cst_76 : f32 to vector<8x512xf32>
    %171 = vector.shape_cast %71 : vector<1x512xi1> to vector<1x512xi1>
    %172 = vector.broadcast %171 : vector<1x512xi1> to vector<8x512xi1>
    %173 = arith.select %172, %169, %170 : vector<8x512xi1>, vector<8x512xf32>
    %c0_77 = arith.constant 0 : index
    %c16 = arith.constant 16 : index
    %c0_78 = arith.constant 0 : index
    %174 = vector.load %arg11[%c0_77, %c16, %c0_78] : memref<2x72x512xf32, #tpu.memory_space<vmem>>, vector<1x8x512xf32>
    %175 = vector.shape_cast %174 : vector<1x8x512xf32> to vector<8x512xf32>
    %176 = vector.shape_cast %173 : vector<8x512xf32> to vector<1x8x512xf32>
    tpu.vector_store %arg11[%c0_77, %c16, %c0_78], %176 {strides = array<i32>} : memref<2x72x512xf32, #tpu.memory_space<vmem>>, vector<1x8x512xf32>,
    %c1_i32_79 = arith.constant 1 : i32
    %177 = tpu.dynamic_rotate %25 by %c1_i32_79 dim 1 : vector<8x640xf32>, i32 -> vector<8x640xf32>
    %178 = vector.extract_strided_slice %177 {offsets = [0, 0], sizes = [8, 512], strides = [1, 1]} : vector<8x640xf32> to vector<8x512xf32>
    %cst_80 = arith.constant 0.000000e+00 : f32
    %179 = vector.broadcast %cst_80 : f32 to vector<8x512xf32>
    %180 = vector.shape_cast %90 : vector<1x512xi1> to vector<1x512xi1>
    %181 = vector.broadcast %180 : vector<1x512xi1> to vector<8x512xi1>
    %182 = arith.select %181, %178, %179 : vector<8x512xi1>, vector<8x512xf32>
    %c0_81 = arith.constant 0 : index
    %c24 = arith.constant 24 : index
    %c0_82 = arith.constant 0 : index
    %183 = vector.load %arg11[%c0_81, %c24, %c0_82] : memref<2x72x512xf32, #tpu.memory_space<vmem>>, vector<1x8x512xf32>
    %184 = vector.shape_cast %183 : vector<1x8x512xf32> to vector<8x512xf32>
    %185 = vector.shape_cast %182 : vector<8x512xf32> to vector<1x8x512xf32>
    tpu.vector_store %arg11[%c0_81, %c24, %c0_82], %185 {strides = array<i32>} : memref<2x72x512xf32, #tpu.memory_space<vmem>>, vector<1x8x512xf32>,
    %186 = vector.extract_strided_slice %25 {offsets = [0, 0], sizes = [8, 512], strides = [1, 1]} : vector<8x640xf32> to vector<8x512xf32>
    %cst_83 = arith.constant 0.000000e+00 : f32
    %187 = vector.broadcast %cst_83 : f32 to vector<8x512xf32>
    %188 = vector.shape_cast %100 : vector<1x512xi1> to vector<1x512xi1>
    %189 = vector.broadcast %188 : vector<1x512xi1> to vector<8x512xi1>
    %190 = arith.select %189, %186, %187 : vector<8x512xi1>, vector<8x512xf32>
    %c0_84 = arith.constant 0 : index
    %c32 = arith.constant 32 : index
    %c0_85 = arith.constant 0 : index
    %191 = vector.load %arg11[%c0_84, %c32, %c0_85] : memref<2x72x512xf32, #tpu.memory_space<vmem>>, vector<1x8x512xf32>
    %192 = vector.shape_cast %191 : vector<1x8x512xf32> to vector<8x512xf32>
    %193 = vector.shape_cast %190 : vector<8x512xf32> to vector<1x8x512xf32>
    tpu.vector_store %arg11[%c0_84, %c32, %c0_85], %193 {strides = array<i32>} : memref<2x72x512xf32, #tpu.memory_space<vmem>>, vector<1x8x512xf32>,
    %c639_i32 = arith.constant 639 : i32
    %194 = tpu.dynamic_rotate %25 by %c639_i32 dim 1 : vector<8x640xf32>, i32 -> vector<8x640xf32>
    %195 = vector.extract_strided_slice %194 {offsets = [0, 0], sizes = [8, 512], strides = [1, 1]} : vector<8x640xf32> to vector<8x512xf32>
    %cst_86 = arith.constant 0.000000e+00 : f32
    %196 = vector.broadcast %cst_86 : f32 to vector<8x512xf32>
    %197 = vector.shape_cast %110 : vector<1x512xi1> to vector<1x512xi1>
    %198 = vector.broadcast %197 : vector<1x512xi1> to vector<8x512xi1>
    %199 = arith.select %198, %195, %196 : vector<8x512xi1>, vector<8x512xf32>
    %c0_87 = arith.constant 0 : index
    %c40 = arith.constant 40 : index
    %c0_88 = arith.constant 0 : index
    %200 = vector.load %arg11[%c0_87, %c40, %c0_88] : memref<2x72x512xf32, #tpu.memory_space<vmem>>, vector<1x8x512xf32>
    %201 = vector.shape_cast %200 : vector<1x8x512xf32> to vector<8x512xf32>
    %202 = vector.shape_cast %199 : vector<8x512xf32> to vector<1x8x512xf32>
    tpu.vector_store %arg11[%c0_87, %c40, %c0_88], %202 {strides = array<i32>} : memref<2x72x512xf32, #tpu.memory_space<vmem>>, vector<1x8x512xf32>,
    %c633_i32 = arith.constant 633 : i32
    %203 = tpu.dynamic_rotate %25 by %c633_i32 dim 1 : vector<8x640xf32>, i32 -> vector<8x640xf32>
    %204 = vector.extract_strided_slice %203 {offsets = [0, 0], sizes = [8, 512], strides = [1, 1]} : vector<8x640xf32> to vector<8x512xf32>
    %cst_89 = arith.constant 0.000000e+00 : f32
    %205 = vector.broadcast %cst_89 : f32 to vector<8x512xf32>
    %206 = vector.shape_cast %129 : vector<1x512xi1> to vector<1x512xi1>
    %207 = vector.broadcast %206 : vector<1x512xi1> to vector<8x512xi1>
    %208 = arith.select %207, %204, %205 : vector<8x512xi1>, vector<8x512xf32>
    %c0_90 = arith.constant 0 : index
    %c48 = arith.constant 48 : index
    %c0_91 = arith.constant 0 : index
    %209 = vector.load %arg11[%c0_90, %c48, %c0_91] : memref<2x72x512xf32, #tpu.memory_space<vmem>>, vector<1x8x512xf32>
    %210 = vector.shape_cast %209 : vector<1x8x512xf32> to vector<8x512xf32>
    %211 = vector.shape_cast %208 : vector<8x512xf32> to vector<1x8x512xf32>
    tpu.vector_store %arg11[%c0_90, %c48, %c0_91], %211 {strides = array<i32>} : memref<2x72x512xf32, #tpu.memory_space<vmem>>, vector<1x8x512xf32>,
    %c632_i32 = arith.constant 632 : i32
    %212 = tpu.dynamic_rotate %25 by %c632_i32 dim 1 : vector<8x640xf32>, i32 -> vector<8x640xf32>
    %213 = vector.extract_strided_slice %212 {offsets = [0, 0], sizes = [8, 512], strides = [1, 1]} : vector<8x640xf32> to vector<8x512xf32>
    %cst_92 = arith.constant 0.000000e+00 : f32
    %214 = vector.broadcast %cst_92 : f32 to vector<8x512xf32>
    %215 = vector.shape_cast %139 : vector<1x512xi1> to vector<1x512xi1>
    %216 = vector.broadcast %215 : vector<1x512xi1> to vector<8x512xi1>
    %217 = arith.select %216, %213, %214 : vector<8x512xi1>, vector<8x512xf32>
    %c0_93 = arith.constant 0 : index
    %c56 = arith.constant 56 : index
    %c0_94 = arith.constant 0 : index
    %218 = vector.load %arg11[%c0_93, %c56, %c0_94] : memref<2x72x512xf32, #tpu.memory_space<vmem>>, vector<1x8x512xf32>
    %219 = vector.shape_cast %218 : vector<1x8x512xf32> to vector<8x512xf32>
    %220 = vector.shape_cast %217 : vector<8x512xf32> to vector<1x8x512xf32>
    tpu.vector_store %arg11[%c0_93, %c56, %c0_94], %220 {strides = array<i32>} : memref<2x72x512xf32, #tpu.memory_space<vmem>>, vector<1x8x512xf32>,
    %c631_i32 = arith.constant 631 : i32
    %221 = tpu.dynamic_rotate %25 by %c631_i32 dim 1 : vector<8x640xf32>, i32 -> vector<8x640xf32>
    %222 = vector.extract_strided_slice %221 {offsets = [0, 0], sizes = [8, 512], strides = [1, 1]} : vector<8x640xf32> to vector<8x512xf32>
    %cst_95 = arith.constant 0.000000e+00 : f32
    %223 = vector.broadcast %cst_95 : f32 to vector<8x512xf32>
    %224 = vector.shape_cast %149 : vector<1x512xi1> to vector<1x512xi1>
    %225 = vector.broadcast %224 : vector<1x512xi1> to vector<8x512xi1>
    %226 = arith.select %225, %222, %223 : vector<8x512xi1>, vector<8x512xf32>
    %c0_96 = arith.constant 0 : index
    %c64_97 = arith.constant 64 : index
    %c0_98 = arith.constant 0 : index
    %227 = vector.load %arg11[%c0_96, %c64_97, %c0_98] : memref<2x72x512xf32, #tpu.memory_space<vmem>>, vector<1x8x512xf32>
    %228 = vector.shape_cast %227 : vector<1x8x512xf32> to vector<8x512xf32>
    %229 = vector.shape_cast %226 : vector<8x512xf32> to vector<1x8x512xf32>
    tpu.vector_store %arg11[%c0_96, %c64_97, %c0_98], %229 {strides = array<i32>} : memref<2x72x512xf32, #tpu.memory_space<vmem>>, vector<1x8x512xf32>,
    %c0_99 = arith.constant 0 : index
    %c0_100 = arith.constant 0 : index
    %c0_101 = arith.constant 0 : index
    %230 = vector.load %arg5[%c0_99, %c0_100, %c0_101] : memref<3x8x72xf32, #tpu.memory_space<vmem>>, vector<1x8x72xf32>
    %231 = vector.shape_cast %230 : vector<1x8x72xf32> to vector<8x72xf32>
    %c0_102 = arith.constant 0 : index
    %c0_103 = arith.constant 0 : index
    %c0_104 = arith.constant 0 : index
    %232 = vector.load %arg11[%c0_102, %c0_103, %c0_104] : memref<2x72x512xf32, #tpu.memory_space<vmem>>, vector<1x72x512xf32>
    %233 = vector.shape_cast %232 : vector<1x72x512xf32> to vector<72x512xf32>
    %cst_105 = arith.constant dense<0.000000e+00> : vector<8x512xf32>
    %234 = tpu.matmul %231, %233, %cst_105 {dimension_numbers = #tpu.dot_dimension_numbers<[1], [0], [0], [1], [0, 0, 1, 1], [], []>} : vector<8x72xf32>, vector<72x512xf32>, vector<8x512xf32> -> vector<8x512xf32>
    %c0_106 = arith.constant 0 : index
    %c0_107 = arith.constant 0 : index
    %235 = vector.load %arg12[%c0_106, %c0_107] : memref<8x512xf32, #tpu.memory_space<vmem>>, vector<8x512xf32>
    tpu.vector_store %arg12[%c0_106, %c0_107], %234 {strides = array<i32>} : memref<8x512xf32, #tpu.memory_space<vmem>>, vector<8x512xf32>,
    %c585_i32 = arith.constant 585 : i32
    %236 = tpu.dynamic_rotate %25 by %c585_i32 dim 1 : vector<8x640xf32>, i32 -> vector<8x640xf32>
    %237 = vector.extract_strided_slice %236 {offsets = [0, 0], sizes = [8, 512], strides = [1, 1]} : vector<8x640xf32> to vector<8x512xf32>
    %cst_108 = arith.constant 0.000000e+00 : f32
    %238 = vector.broadcast %cst_108 : f32 to vector<8x512xf32>
    %239 = vector.shape_cast %51 : vector<1x512xi1> to vector<1x512xi1>
    %240 = vector.broadcast %239 : vector<1x512xi1> to vector<8x512xi1>
    %241 = arith.select %240, %237, %238 : vector<8x512xi1>, vector<8x512xf32>
    %c1 = arith.constant 1 : index
    %c0_109 = arith.constant 0 : index
    %c0_110 = arith.constant 0 : index
    %242 = vector.load %arg11[%c1, %c0_109, %c0_110] : memref<2x72x512xf32, #tpu.memory_space<vmem>>, vector<1x8x512xf32>
    %243 = vector.shape_cast %242 : vector<1x8x512xf32> to vector<8x512xf32>
    %244 = vector.shape_cast %241 : vector<8x512xf32> to vector<1x8x512xf32>
    tpu.vector_store %arg11[%c1, %c0_109, %c0_110], %244 {strides = array<i32>} : memref<2x72x512xf32, #tpu.memory_space<vmem>>, vector<1x8x512xf32>,
    %c584_i32 = arith.constant 584 : i32
    %245 = tpu.dynamic_rotate %25 by %c584_i32 dim 1 : vector<8x640xf32>, i32 -> vector<8x640xf32>
    %246 = vector.extract_strided_slice %245 {offsets = [0, 0], sizes = [8, 512], strides = [1, 1]} : vector<8x640xf32> to vector<8x512xf32>
    %cst_111 = arith.constant 0.000000e+00 : f32
    %247 = vector.broadcast %cst_111 : f32 to vector<8x512xf32>
    %248 = vector.shape_cast %61 : vector<1x512xi1> to vector<1x512xi1>
    %249 = vector.broadcast %248 : vector<1x512xi1> to vector<8x512xi1>
    %250 = arith.select %249, %246, %247 : vector<8x512xi1>, vector<8x512xf32>
    %c1_112 = arith.constant 1 : index
    %c8_113 = arith.constant 8 : index
    %c0_114 = arith.constant 0 : index
    %251 = vector.load %arg11[%c1_112, %c8_113, %c0_114] : memref<2x72x512xf32, #tpu.memory_space<vmem>>, vector<1x8x512xf32>
    %252 = vector.shape_cast %251 : vector<1x8x512xf32> to vector<8x512xf32>
    %253 = vector.shape_cast %250 : vector<8x512xf32> to vector<1x8x512xf32>
    tpu.vector_store %arg11[%c1_112, %c8_113, %c0_114], %253 {strides = array<i32>} : memref<2x72x512xf32, #tpu.memory_space<vmem>>, vector<1x8x512xf32>,
    %c583_i32 = arith.constant 583 : i32
    %254 = tpu.dynamic_rotate %25 by %c583_i32 dim 1 : vector<8x640xf32>, i32 -> vector<8x640xf32>
    %255 = vector.extract_strided_slice %254 {offsets = [0, 0], sizes = [8, 512], strides = [1, 1]} : vector<8x640xf32> to vector<8x512xf32>
    %cst_115 = arith.constant 0.000000e+00 : f32
    %256 = vector.broadcast %cst_115 : f32 to vector<8x512xf32>
    %257 = vector.shape_cast %71 : vector<1x512xi1> to vector<1x512xi1>
    %258 = vector.broadcast %257 : vector<1x512xi1> to vector<8x512xi1>
    %259 = arith.select %258, %255, %256 : vector<8x512xi1>, vector<8x512xf32>
    %c1_116 = arith.constant 1 : index
    %c16_117 = arith.constant 16 : index
    %c0_118 = arith.constant 0 : index
    %260 = vector.load %arg11[%c1_116, %c16_117, %c0_118] : memref<2x72x512xf32, #tpu.memory_space<vmem>>, vector<1x8x512xf32>
    %261 = vector.shape_cast %260 : vector<1x8x512xf32> to vector<8x512xf32>
    %262 = vector.shape_cast %259 : vector<8x512xf32> to vector<1x8x512xf32>
    tpu.vector_store %arg11[%c1_116, %c16_117, %c0_118], %262 {strides = array<i32>} : memref<2x72x512xf32, #tpu.memory_space<vmem>>, vector<1x8x512xf32>,
    %c577_i32 = arith.constant 577 : i32
    %263 = tpu.dynamic_rotate %25 by %c577_i32 dim 1 : vector<8x640xf32>, i32 -> vector<8x640xf32>
    %264 = vector.extract_strided_slice %263 {offsets = [0, 0], sizes = [8, 512], strides = [1, 1]} : vector<8x640xf32> to vector<8x512xf32>
    %cst_119 = arith.constant 0.000000e+00 : f32
    %265 = vector.broadcast %cst_119 : f32 to vector<8x512xf32>
    %266 = vector.shape_cast %90 : vector<1x512xi1> to vector<1x512xi1>
    %267 = vector.broadcast %266 : vector<1x512xi1> to vector<8x512xi1>
    %268 = arith.select %267, %264, %265 : vector<8x512xi1>, vector<8x512xf32>
    %c1_120 = arith.constant 1 : index
    %c24_121 = arith.constant 24 : index
    %c0_122 = arith.constant 0 : index
    %269 = vector.load %arg11[%c1_120, %c24_121, %c0_122] : memref<2x72x512xf32, #tpu.memory_space<vmem>>, vector<1x8x512xf32>
    %270 = vector.shape_cast %269 : vector<1x8x512xf32> to vector<8x512xf32>
    %271 = vector.shape_cast %268 : vector<8x512xf32> to vector<1x8x512xf32>
    tpu.vector_store %arg11[%c1_120, %c24_121, %c0_122], %271 {strides = array<i32>} : memref<2x72x512xf32, #tpu.memory_space<vmem>>, vector<1x8x512xf32>,
    %c576_i32 = arith.constant 576 : i32
    %272 = tpu.dynamic_rotate %25 by %c576_i32 dim 1 : vector<8x640xf32>, i32 -> vector<8x640xf32>
    %273 = vector.extract_strided_slice %272 {offsets = [0, 0], sizes = [8, 512], strides = [1, 1]} : vector<8x640xf32> to vector<8x512xf32>
    %cst_123 = arith.constant 0.000000e+00 : f32
    %274 = vector.broadcast %cst_123 : f32 to vector<8x512xf32>
    %275 = vector.shape_cast %100 : vector<1x512xi1> to vector<1x512xi1>
    %276 = vector.broadcast %275 : vector<1x512xi1> to vector<8x512xi1>
    %277 = arith.select %276, %273, %274 : vector<8x512xi1>, vector<8x512xf32>
    %c1_124 = arith.constant 1 : index
    %c32_125 = arith.constant 32 : index
    %c0_126 = arith.constant 0 : index
    %278 = vector.load %arg11[%c1_124, %c32_125, %c0_126] : memref<2x72x512xf32, #tpu.memory_space<vmem>>, vector<1x8x512xf32>
    %279 = vector.shape_cast %278 : vector<1x8x512xf32> to vector<8x512xf32>
    %280 = vector.shape_cast %277 : vector<8x512xf32> to vector<1x8x512xf32>
    tpu.vector_store %arg11[%c1_124, %c32_125, %c0_126], %280 {strides = array<i32>} : memref<2x72x512xf32, #tpu.memory_space<vmem>>, vector<1x8x512xf32>,
    %c575_i32 = arith.constant 575 : i32
    %281 = tpu.dynamic_rotate %25 by %c575_i32 dim 1 : vector<8x640xf32>, i32 -> vector<8x640xf32>
    %282 = vector.extract_strided_slice %281 {offsets = [0, 0], sizes = [8, 512], strides = [1, 1]} : vector<8x640xf32> to vector<8x512xf32>
    %cst_127 = arith.constant 0.000000e+00 : f32
    %283 = vector.broadcast %cst_127 : f32 to vector<8x512xf32>
    %284 = vector.shape_cast %110 : vector<1x512xi1> to vector<1x512xi1>
    %285 = vector.broadcast %284 : vector<1x512xi1> to vector<8x512xi1>
    %286 = arith.select %285, %282, %283 : vector<8x512xi1>, vector<8x512xf32>
    %c1_128 = arith.constant 1 : index
    %c40_129 = arith.constant 40 : index
    %c0_130 = arith.constant 0 : index
    %287 = vector.load %arg11[%c1_128, %c40_129, %c0_130] : memref<2x72x512xf32, #tpu.memory_space<vmem>>, vector<1x8x512xf32>
    %288 = vector.shape_cast %287 : vector<1x8x512xf32> to vector<8x512xf32>
    %289 = vector.shape_cast %286 : vector<8x512xf32> to vector<1x8x512xf32>
    tpu.vector_store %arg11[%c1_128, %c40_129, %c0_130], %289 {strides = array<i32>} : memref<2x72x512xf32, #tpu.memory_space<vmem>>, vector<1x8x512xf32>,
    %c569_i32 = arith.constant 569 : i32
    %290 = tpu.dynamic_rotate %25 by %c569_i32 dim 1 : vector<8x640xf32>, i32 -> vector<8x640xf32>
    %291 = vector.extract_strided_slice %290 {offsets = [0, 0], sizes = [8, 512], strides = [1, 1]} : vector<8x640xf32> to vector<8x512xf32>
    %cst_131 = arith.constant 0.000000e+00 : f32
    %292 = vector.broadcast %cst_131 : f32 to vector<8x512xf32>
    %293 = vector.shape_cast %129 : vector<1x512xi1> to vector<1x512xi1>
    %294 = vector.broadcast %293 : vector<1x512xi1> to vector<8x512xi1>
    %295 = arith.select %294, %291, %292 : vector<8x512xi1>, vector<8x512xf32>
    %c1_132 = arith.constant 1 : index
    %c48_133 = arith.constant 48 : index
    %c0_134 = arith.constant 0 : index
    %296 = vector.load %arg11[%c1_132, %c48_133, %c0_134] : memref<2x72x512xf32, #tpu.memory_space<vmem>>, vector<1x8x512xf32>
    %297 = vector.shape_cast %296 : vector<1x8x512xf32> to vector<8x512xf32>
    %298 = vector.shape_cast %295 : vector<8x512xf32> to vector<1x8x512xf32>
    tpu.vector_store %arg11[%c1_132, %c48_133, %c0_134], %298 {strides = array<i32>} : memref<2x72x512xf32, #tpu.memory_space<vmem>>, vector<1x8x512xf32>,
    %c568_i32 = arith.constant 568 : i32
    %299 = tpu.dynamic_rotate %25 by %c568_i32 dim 1 : vector<8x640xf32>, i32 -> vector<8x640xf32>
    %300 = vector.extract_strided_slice %299 {offsets = [0, 0], sizes = [8, 512], strides = [1, 1]} : vector<8x640xf32> to vector<8x512xf32>
    %cst_135 = arith.constant 0.000000e+00 : f32
    %301 = vector.broadcast %cst_135 : f32 to vector<8x512xf32>
    %302 = vector.shape_cast %139 : vector<1x512xi1> to vector<1x512xi1>
    %303 = vector.broadcast %302 : vector<1x512xi1> to vector<8x512xi1>
    %304 = arith.select %303, %300, %301 : vector<8x512xi1>, vector<8x512xf32>
    %c1_136 = arith.constant 1 : index
    %c56_137 = arith.constant 56 : index
    %c0_138 = arith.constant 0 : index
    %305 = vector.load %arg11[%c1_136, %c56_137, %c0_138] : memref<2x72x512xf32, #tpu.memory_space<vmem>>, vector<1x8x512xf32>
    %306 = vector.shape_cast %305 : vector<1x8x512xf32> to vector<8x512xf32>
    %307 = vector.shape_cast %304 : vector<8x512xf32> to vector<1x8x512xf32>
    tpu.vector_store %arg11[%c1_136, %c56_137, %c0_138], %307 {strides = array<i32>} : memref<2x72x512xf32, #tpu.memory_space<vmem>>, vector<1x8x512xf32>,
    %c567_i32 = arith.constant 567 : i32
    %308 = tpu.dynamic_rotate %25 by %c567_i32 dim 1 : vector<8x640xf32>, i32 -> vector<8x640xf32>
    %309 = vector.extract_strided_slice %308 {offsets = [0, 0], sizes = [8, 512], strides = [1, 1]} : vector<8x640xf32> to vector<8x512xf32>
    %cst_139 = arith.constant 0.000000e+00 : f32
    %310 = vector.broadcast %cst_139 : f32 to vector<8x512xf32>
    %311 = vector.shape_cast %149 : vector<1x512xi1> to vector<1x512xi1>
    %312 = vector.broadcast %311 : vector<1x512xi1> to vector<8x512xi1>
    %313 = arith.select %312, %309, %310 : vector<8x512xi1>, vector<8x512xf32>
    %c1_140 = arith.constant 1 : index
    %c64_141 = arith.constant 64 : index
    %c0_142 = arith.constant 0 : index
    %314 = vector.load %arg11[%c1_140, %c64_141, %c0_142] : memref<2x72x512xf32, #tpu.memory_space<vmem>>, vector<1x8x512xf32>
    %315 = vector.shape_cast %314 : vector<1x8x512xf32> to vector<8x512xf32>
    %316 = vector.shape_cast %313 : vector<8x512xf32> to vector<1x8x512xf32>
    tpu.vector_store %arg11[%c1_140, %c64_141, %c0_142], %316 {strides = array<i32>} : memref<2x72x512xf32, #tpu.memory_space<vmem>>, vector<1x8x512xf32>,
    %c1_143 = arith.constant 1 : index
    %c0_144 = arith.constant 0 : index
    %c0_145 = arith.constant 0 : index
    %317 = vector.load %arg5[%c1_143, %c0_144, %c0_145] : memref<3x8x72xf32, #tpu.memory_space<vmem>>, vector<1x8x72xf32>
    %318 = vector.shape_cast %317 : vector<1x8x72xf32> to vector<8x72xf32>
    %c1_146 = arith.constant 1 : index
    %c0_147 = arith.constant 0 : index
    %c0_148 = arith.constant 0 : index
    %319 = vector.load %arg11[%c1_146, %c0_147, %c0_148] : memref<2x72x512xf32, #tpu.memory_space<vmem>>, vector<1x72x512xf32>
    %320 = vector.shape_cast %319 : vector<1x72x512xf32> to vector<72x512xf32>
    %cst_149 = arith.constant dense<0.000000e+00> : vector<8x512xf32>
    %321 = tpu.matmul %318, %320, %cst_149 {dimension_numbers = #tpu.dot_dimension_numbers<[1], [0], [0], [1], [0, 0, 1, 1], [], []>} : vector<8x72xf32>, vector<72x512xf32>, vector<8x512xf32> -> vector<8x512xf32>
    %c0_150 = arith.constant 0 : index
    %c0_151 = arith.constant 0 : index
    %322 = vector.load %arg12[%c0_150, %c0_151] : memref<8x512xf32, #tpu.memory_space<vmem>>, vector<8x512xf32>
    %323 = arith.addf %322, %321 : vector<8x512xf32>
    %c0_152 = arith.constant 0 : index
    %c0_153 = arith.constant 0 : index
    %324 = vector.load %arg12[%c0_152, %c0_153] : memref<8x512xf32, #tpu.memory_space<vmem>>, vector<8x512xf32>
    tpu.vector_store %arg12[%c0_152, %c0_153], %323 {strides = array<i32>} : memref<8x512xf32, #tpu.memory_space<vmem>>, vector<8x512xf32>,
    %c521_i32 = arith.constant 521 : i32
    %325 = tpu.dynamic_rotate %25 by %c521_i32 dim 1 : vector<8x640xf32>, i32 -> vector<8x640xf32>
    %326 = vector.extract_strided_slice %325 {offsets = [0, 0], sizes = [8, 512], strides = [1, 1]} : vector<8x640xf32> to vector<8x512xf32>
    %cst_154 = arith.constant 0.000000e+00 : f32
    %327 = vector.broadcast %cst_154 : f32 to vector<8x512xf32>
    %328 = vector.shape_cast %51 : vector<1x512xi1> to vector<1x512xi1>
    %329 = vector.broadcast %328 : vector<1x512xi1> to vector<8x512xi1>
    %330 = arith.select %329, %326, %327 : vector<8x512xi1>, vector<8x512xf32>
    %c0_155 = arith.constant 0 : index
    %c0_156 = arith.constant 0 : index
    %c0_157 = arith.constant 0 : index
    %331 = vector.load %arg11[%c0_155, %c0_156, %c0_157] : memref<2x72x512xf32, #tpu.memory_space<vmem>>, vector<1x8x512xf32>
    %332 = vector.shape_cast %331 : vector<1x8x512xf32> to vector<8x512xf32>
    %333 = vector.shape_cast %330 : vector<8x512xf32> to vector<1x8x512xf32>
    tpu.vector_store %arg11[%c0_155, %c0_156, %c0_157], %333 {strides = array<i32>} : memref<2x72x512xf32, #tpu.memory_space<vmem>>, vector<1x8x512xf32>,
    %c520_i32 = arith.constant 520 : i32
    %334 = tpu.dynamic_rotate %25 by %c520_i32 dim 1 : vector<8x640xf32>, i32 -> vector<8x640xf32>
    %335 = vector.extract_strided_slice %334 {offsets = [0, 0], sizes = [8, 512], strides = [1, 1]} : vector<8x640xf32> to vector<8x512xf32>
    %cst_158 = arith.constant 0.000000e+00 : f32
    %336 = vector.broadcast %cst_158 : f32 to vector<8x512xf32>
    %337 = vector.shape_cast %61 : vector<1x512xi1> to vector<1x512xi1>
    %338 = vector.broadcast %337 : vector<1x512xi1> to vector<8x512xi1>
    %339 = arith.select %338, %335, %336 : vector<8x512xi1>, vector<8x512xf32>
    %c0_159 = arith.constant 0 : index
    %c8_160 = arith.constant 8 : index
    %c0_161 = arith.constant 0 : index
    %340 = vector.load %arg11[%c0_159, %c8_160, %c0_161] : memref<2x72x512xf32, #tpu.memory_space<vmem>>, vector<1x8x512xf32>
    %341 = vector.shape_cast %340 : vector<1x8x512xf32> to vector<8x512xf32>
    %342 = vector.shape_cast %339 : vector<8x512xf32> to vector<1x8x512xf32>
    tpu.vector_store %arg11[%c0_159, %c8_160, %c0_161], %342 {strides = array<i32>} : memref<2x72x512xf32, #tpu.memory_space<vmem>>, vector<1x8x512xf32>,
    %c519_i32 = arith.constant 519 : i32
    %343 = tpu.dynamic_rotate %25 by %c519_i32 dim 1 : vector<8x640xf32>, i32 -> vector<8x640xf32>
    %344 = vector.extract_strided_slice %343 {offsets = [0, 0], sizes = [8, 512], strides = [1, 1]} : vector<8x640xf32> to vector<8x512xf32>
    %cst_162 = arith.constant 0.000000e+00 : f32
    %345 = vector.broadcast %cst_162 : f32 to vector<8x512xf32>
    %346 = vector.shape_cast %71 : vector<1x512xi1> to vector<1x512xi1>
    %347 = vector.broadcast %346 : vector<1x512xi1> to vector<8x512xi1>
    %348 = arith.select %347, %344, %345 : vector<8x512xi1>, vector<8x512xf32>
    %c0_163 = arith.constant 0 : index
    %c16_164 = arith.constant 16 : index
    %c0_165 = arith.constant 0 : index
    %349 = vector.load %arg11[%c0_163, %c16_164, %c0_165] : memref<2x72x512xf32, #tpu.memory_space<vmem>>, vector<1x8x512xf32>
    %350 = vector.shape_cast %349 : vector<1x8x512xf32> to vector<8x512xf32>
    %351 = vector.shape_cast %348 : vector<8x512xf32> to vector<1x8x512xf32>
    tpu.vector_store %arg11[%c0_163, %c16_164, %c0_165], %351 {strides = array<i32>} : memref<2x72x512xf32, #tpu.memory_space<vmem>>, vector<1x8x512xf32>,
    %c513_i32 = arith.constant 513 : i32
    %352 = tpu.dynamic_rotate %25 by %c513_i32 dim 1 : vector<8x640xf32>, i32 -> vector<8x640xf32>
    %353 = vector.extract_strided_slice %352 {offsets = [0, 0], sizes = [8, 512], strides = [1, 1]} : vector<8x640xf32> to vector<8x512xf32>
    %cst_166 = arith.constant 0.000000e+00 : f32
    %354 = vector.broadcast %cst_166 : f32 to vector<8x512xf32>
    %355 = vector.shape_cast %90 : vector<1x512xi1> to vector<1x512xi1>
    %356 = vector.broadcast %355 : vector<1x512xi1> to vector<8x512xi1>
    %357 = arith.select %356, %353, %354 : vector<8x512xi1>, vector<8x512xf32>
    %c0_167 = arith.constant 0 : index
    %c24_168 = arith.constant 24 : index
    %c0_169 = arith.constant 0 : index
    %358 = vector.load %arg11[%c0_167, %c24_168, %c0_169] : memref<2x72x512xf32, #tpu.memory_space<vmem>>, vector<1x8x512xf32>
    %359 = vector.shape_cast %358 : vector<1x8x512xf32> to vector<8x512xf32>
    %360 = vector.shape_cast %357 : vector<8x512xf32> to vector<1x8x512xf32>
    tpu.vector_store %arg11[%c0_167, %c24_168, %c0_169], %360 {strides = array<i32>} : memref<2x72x512xf32, #tpu.memory_space<vmem>>, vector<1x8x512xf32>,
    %c512_i32 = arith.constant 512 : i32
    %361 = tpu.dynamic_rotate %25 by %c512_i32 dim 1 : vector<8x640xf32>, i32 -> vector<8x640xf32>
    %362 = vector.extract_strided_slice %361 {offsets = [0, 0], sizes = [8, 512], strides = [1, 1]} : vector<8x640xf32> to vector<8x512xf32>
    %cst_170 = arith.constant 0.000000e+00 : f32
    %363 = vector.broadcast %cst_170 : f32 to vector<8x512xf32>
    %364 = vector.shape_cast %100 : vector<1x512xi1> to vector<1x512xi1>
    %365 = vector.broadcast %364 : vector<1x512xi1> to vector<8x512xi1>
    %366 = arith.select %365, %362, %363 : vector<8x512xi1>, vector<8x512xf32>
    %c0_171 = arith.constant 0 : index
    %c32_172 = arith.constant 32 : index
    %c0_173 = arith.constant 0 : index
    %367 = vector.load %arg11[%c0_171, %c32_172, %c0_173] : memref<2x72x512xf32, #tpu.memory_space<vmem>>, vector<1x8x512xf32>
    %368 = vector.shape_cast %367 : vector<1x8x512xf32> to vector<8x512xf32>
    %369 = vector.shape_cast %366 : vector<8x512xf32> to vector<1x8x512xf32>
    tpu.vector_store %arg11[%c0_171, %c32_172, %c0_173], %369 {strides = array<i32>} : memref<2x72x512xf32, #tpu.memory_space<vmem>>, vector<1x8x512xf32>,
    %c511_i32 = arith.constant 511 : i32
    %370 = tpu.dynamic_rotate %25 by %c511_i32 dim 1 : vector<8x640xf32>, i32 -> vector<8x640xf32>
    %371 = vector.extract_strided_slice %370 {offsets = [0, 0], sizes = [8, 512], strides = [1, 1]} : vector<8x640xf32> to vector<8x512xf32>
    %cst_174 = arith.constant 0.000000e+00 : f32
    %372 = vector.broadcast %cst_174 : f32 to vector<8x512xf32>
    %373 = vector.shape_cast %110 : vector<1x512xi1> to vector<1x512xi1>
    %374 = vector.broadcast %373 : vector<1x512xi1> to vector<8x512xi1>
    %375 = arith.select %374, %371, %372 : vector<8x512xi1>, vector<8x512xf32>
    %c0_175 = arith.constant 0 : index
    %c40_176 = arith.constant 40 : index
    %c0_177 = arith.constant 0 : index
    %376 = vector.load %arg11[%c0_175, %c40_176, %c0_177] : memref<2x72x512xf32, #tpu.memory_space<vmem>>, vector<1x8x512xf32>
    %377 = vector.shape_cast %376 : vector<1x8x512xf32> to vector<8x512xf32>
    %378 = vector.shape_cast %375 : vector<8x512xf32> to vector<1x8x512xf32>
    tpu.vector_store %arg11[%c0_175, %c40_176, %c0_177], %378 {strides = array<i32>} : memref<2x72x512xf32, #tpu.memory_space<vmem>>, vector<1x8x512xf32>,
    %c505_i32 = arith.constant 505 : i32
    %379 = tpu.dynamic_rotate %25 by %c505_i32 dim 1 : vector<8x640xf32>, i32 -> vector<8x640xf32>
    %380 = vector.extract_strided_slice %379 {offsets = [0, 0], sizes = [8, 512], strides = [1, 1]} : vector<8x640xf32> to vector<8x512xf32>
    %cst_178 = arith.constant 0.000000e+00 : f32
    %381 = vector.broadcast %cst_178 : f32 to vector<8x512xf32>
    %382 = vector.shape_cast %129 : vector<1x512xi1> to vector<1x512xi1>
    %383 = vector.broadcast %382 : vector<1x512xi1> to vector<8x512xi1>
    %384 = arith.select %383, %380, %381 : vector<8x512xi1>, vector<8x512xf32>
    %c0_179 = arith.constant 0 : index
    %c48_180 = arith.constant 48 : index
    %c0_181 = arith.constant 0 : index
    %385 = vector.load %arg11[%c0_179, %c48_180, %c0_181] : memref<2x72x512xf32, #tpu.memory_space<vmem>>, vector<1x8x512xf32>
    %386 = vector.shape_cast %385 : vector<1x8x512xf32> to vector<8x512xf32>
    %387 = vector.shape_cast %384 : vector<8x512xf32> to vector<1x8x512xf32>
    tpu.vector_store %arg11[%c0_179, %c48_180, %c0_181], %387 {strides = array<i32>} : memref<2x72x512xf32, #tpu.memory_space<vmem>>, vector<1x8x512xf32>,
    %c504_i32 = arith.constant 504 : i32
    %388 = tpu.dynamic_rotate %25 by %c504_i32 dim 1 : vector<8x640xf32>, i32 -> vector<8x640xf32>
    %389 = vector.extract_strided_slice %388 {offsets = [0, 0], sizes = [8, 512], strides = [1, 1]} : vector<8x640xf32> to vector<8x512xf32>
    %cst_182 = arith.constant 0.000000e+00 : f32
    %390 = vector.broadcast %cst_182 : f32 to vector<8x512xf32>
    %391 = vector.shape_cast %139 : vector<1x512xi1> to vector<1x512xi1>
    %392 = vector.broadcast %391 : vector<1x512xi1> to vector<8x512xi1>
    %393 = arith.select %392, %389, %390 : vector<8x512xi1>, vector<8x512xf32>
    %c0_183 = arith.constant 0 : index
    %c56_184 = arith.constant 56 : index
    %c0_185 = arith.constant 0 : index
    %394 = vector.load %arg11[%c0_183, %c56_184, %c0_185] : memref<2x72x512xf32, #tpu.memory_space<vmem>>, vector<1x8x512xf32>
    %395 = vector.shape_cast %394 : vector<1x8x512xf32> to vector<8x512xf32>
    %396 = vector.shape_cast %393 : vector<8x512xf32> to vector<1x8x512xf32>
    tpu.vector_store %arg11[%c0_183, %c56_184, %c0_185], %396 {strides = array<i32>} : memref<2x72x512xf32, #tpu.memory_space<vmem>>, vector<1x8x512xf32>,
    %c503_i32 = arith.constant 503 : i32
    %397 = tpu.dynamic_rotate %25 by %c503_i32 dim 1 : vector<8x640xf32>, i32 -> vector<8x640xf32>
    %398 = vector.extract_strided_slice %397 {offsets = [0, 0], sizes = [8, 512], strides = [1, 1]} : vector<8x640xf32> to vector<8x512xf32>
    %cst_186 = arith.constant 0.000000e+00 : f32
    %399 = vector.broadcast %cst_186 : f32 to vector<8x512xf32>
    %400 = vector.shape_cast %149 : vector<1x512xi1> to vector<1x512xi1>
    %401 = vector.broadcast %400 : vector<1x512xi1> to vector<8x512xi1>
    %402 = arith.select %401, %398, %399 : vector<8x512xi1>, vector<8x512xf32>
    %c0_187 = arith.constant 0 : index
    %c64_188 = arith.constant 64 : index
    %c0_189 = arith.constant 0 : index
    %403 = vector.load %arg11[%c0_187, %c64_188, %c0_189] : memref<2x72x512xf32, #tpu.memory_space<vmem>>, vector<1x8x512xf32>
    %404 = vector.shape_cast %403 : vector<1x8x512xf32> to vector<8x512xf32>
    %405 = vector.shape_cast %402 : vector<8x512xf32> to vector<1x8x512xf32>
    tpu.vector_store %arg11[%c0_187, %c64_188, %c0_189], %405 {strides = array<i32>} : memref<2x72x512xf32, #tpu.memory_space<vmem>>, vector<1x8x512xf32>,
    %c2 = arith.constant 2 : index
    %c0_190 = arith.constant 0 : index
    %c0_191 = arith.constant 0 : index
    %406 = vector.load %arg5[%c2, %c0_190, %c0_191] : memref<3x8x72xf32, #tpu.memory_space<vmem>>, vector<1x8x72xf32>
    %407 = vector.shape_cast %406 : vector<1x8x72xf32> to vector<8x72xf32>
    %c0_192 = arith.constant 0 : index
    %c0_193 = arith.constant 0 : index
    %c0_194 = arith.constant 0 : index
    %408 = vector.load %arg11[%c0_192, %c0_193, %c0_194] : memref<2x72x512xf32, #tpu.memory_space<vmem>>, vector<1x72x512xf32>
    %409 = vector.shape_cast %408 : vector<1x72x512xf32> to vector<72x512xf32>
    %cst_195 = arith.constant dense<0.000000e+00> : vector<8x512xf32>
    %410 = tpu.matmul %407, %409, %cst_195 {dimension_numbers = #tpu.dot_dimension_numbers<[1], [0], [0], [1], [0, 0, 1, 1], [], []>} : vector<8x72xf32>, vector<72x512xf32>, vector<8x512xf32> -> vector<8x512xf32>
    %c0_196 = arith.constant 0 : index
    %c0_197 = arith.constant 0 : index
    %411 = vector.load %arg12[%c0_196, %c0_197] : memref<8x512xf32, #tpu.memory_space<vmem>>, vector<8x512xf32>
    %412 = arith.addf %411, %410 : vector<8x512xf32>
    %c0_198 = arith.constant 0 : index
    %c0_199 = arith.constant 0 : index
    %413 = vector.load %arg12[%c0_198, %c0_199] : memref<8x512xf32, #tpu.memory_space<vmem>>, vector<8x512xf32>
    tpu.vector_store %arg12[%c0_198, %c0_199], %412 {strides = array<i32>} : memref<8x512xf32, #tpu.memory_space<vmem>>, vector<8x512xf32>,
    %c0_200 = arith.constant 0 : index
    %c0_201 = arith.constant 0 : index
    %414 = vector.load %arg12[%c0_200, %c0_201] : memref<8x512xf32, #tpu.memory_space<vmem>>, vector<8x512xf32>
    %c0_202 = arith.constant 0 : index
    %c0_203 = arith.constant 0 : index
    %415 = vector.load %arg6[%c0_202, %c0_203] : memref<8x1xf32, #tpu.memory_space<vmem>>, vector<8x1xf32>
    %416 = vector.broadcast %415 : vector<8x1xf32> to vector<8x512xf32>
    %417 = arith.addf %414, %416 : vector<8x512xf32>
    %cst_204 = arith.constant 0.000000e+00 : f32
    %418 = vector.broadcast %cst_204 : f32 to vector<8x512xf32>
    %419 = arith.maximumf %417, %418 : vector<8x512xf32>
    %c0_205 = arith.constant 0 : index
    %c0_206 = arith.constant 0 : index
    %420 = vector.load %arg7[%c0_205, %c0_206] : memref<4x8xf32, #tpu.memory_space<vmem>>, vector<4x8xf32>
    %cst_207 = arith.constant dense<0.000000e+00> : vector<4x512xf32>
    %421 = tpu.matmul %420, %419, %cst_207 {dimension_numbers = #tpu.dot_dimension_numbers<[1], [0], [0], [1], [0, 0, 1, 1], [], []>} : vector<4x8xf32>, vector<8x512xf32>, vector<4x512xf32> -> vector<4x512xf32>
    %c0_208 = arith.constant 0 : index
    %c0_209 = arith.constant 0 : index
    %422 = vector.load %arg8[%c0_208, %c0_209] : memref<4x1xf32, #tpu.memory_space<vmem>>, vector<4x1xf32>
    %423 = vector.broadcast %422 : vector<4x1xf32> to vector<4x512xf32>
    %424 = arith.addf %421, %423 : vector<4x512xf32>
    %c0_210 = arith.constant 0 : index
    %c0_211 = arith.constant 0 : index
    %c0_212 = arith.constant 0 : index
    %425 = vector.load %arg2[%c0_210, %c0_211, %c0_212] : memref<1x4x512xf32, #tpu.memory_space<vmem>>, vector<1x4x512xf32>
    %426 = vector.shape_cast %425 : vector<1x4x512xf32> to vector<4x512xf32>
    %427 = arith.addf %424, %426 : vector<4x512xf32>
    %c0_213 = arith.constant 0 : index
    %c0_214 = arith.constant 0 : index
    %c0_215 = arith.constant 0 : index
    %428 = vector.load %arg9[%c0_213, %c0_214, %c0_215] : memref<1x4x512xf32, #tpu.memory_space<vmem>>, vector<1x4x512xf32>
    %429 = vector.shape_cast %428 : vector<1x4x512xf32> to vector<4x512xf32>
    %430 = vector.shape_cast %427 : vector<4x512xf32> to vector<1x4x512xf32>
    tpu.vector_store %arg9[%c0_213, %c0_214, %c0_215], %430 {strides = array<i32>} : memref<1x4x512xf32, #tpu.memory_space<vmem>>, vector<1x4x512xf32>,
    return
  }
  func.func @transform_0(%arg0: i32, %arg1: i32) -> (i32, i32, i32) {
    %c0_i32 = arith.constant 0 : i32
    %c0_i32_0 = arith.constant 0 : i32
    return %arg0, %c0_i32, %arg1 : i32, i32, i32
  }
  func.func @transform_1(%arg0: i32, %arg1: i32) -> (i32, i32, i32) {
    %c1_i32 = arith.constant 1 : i32
    %0 = arith.subi %arg1, %c1_i32 : i32
    %c0_i32 = arith.constant 0 : i32
    %1 = arith.maxsi %0, %c0_i32 : i32
    %c0_i32_0 = arith.constant 0 : i32
    %c0_i32_1 = arith.constant 0 : i32
    return %arg0, %c0_i32_0, %1 : i32, i32, i32
  }
  func.func @transform_2(%arg0: i32, %arg1: i32) -> (i32, i32, i32) {
    %c1_i32 = arith.constant 1 : i32
    %0 = arith.addi %arg1, %c1_i32 : i32
    %c0_i32 = arith.constant 0 : i32
    %1 = arith.minsi %0, %c0_i32 : i32
    %c0_i32_0 = arith.constant 0 : i32
    %c0_i32_1 = arith.constant 0 : i32
    return %arg0, %c0_i32_0, %1 : i32, i32, i32
  }
  func.func @transform_3(%arg0: i32, %arg1: i32) -> (i32, i32, i32) {
    %c0_i32 = arith.constant 0 : i32
    %c0_i32_0 = arith.constant 0 : i32
    %c0_i32_1 = arith.constant 0 : i32
    %c0_i32_2 = arith.constant 0 : i32
    return %c0_i32, %c0_i32_0, %c0_i32_1 : i32, i32, i32
  }
  func.func @transform_4(%arg0: i32, %arg1: i32) -> (i32, i32) {
    %c0_i32 = arith.constant 0 : i32
    %c0_i32_0 = arith.constant 0 : i32
    %c0_i32_1 = arith.constant 0 : i32
    return %c0_i32, %c0_i32_0 : i32, i32
  }
  func.func @transform_5(%arg0: i32, %arg1: i32) -> (i32, i32) {
    %c0_i32 = arith.constant 0 : i32
    %c0_i32_0 = arith.constant 0 : i32
    %c0_i32_1 = arith.constant 0 : i32
    return %c0_i32, %c0_i32_0 : i32, i32
  }
  func.func @transform_6(%arg0: i32, %arg1: i32) -> (i32, i32) {
    %c0_i32 = arith.constant 0 : i32
    %c0_i32_0 = arith.constant 0 : i32
    %c0_i32_1 = arith.constant 0 : i32
    return %c0_i32, %c0_i32_0 : i32, i32
  }
  func.func @transform_7(%arg0: i32, %arg1: i32) -> (i32, i32, i32) {
    %c0_i32 = arith.constant 0 : i32
    %c0_i32_0 = arith.constant 0 : i32
    return %arg0, %c0_i32, %arg1 : i32, i32, i32
  }
}

</mosaic_0001>

<bundles_post_ra>
// kernel: resblock_forward.1
= control target key start
LH: loop header
LB: loop body
LE: loop exit
PB: predicated region body
PF: predicated region fallthrough
CT: control target
= control target key end

     0   :  { %s2652_s24 = smov 0   ;;  %s2654_s25 = smov 0   ;;  %s3577_s0 = inlined_call_operand.vmem [shape: f32[2,4,512], index: 0, kind: input, shape index: {}, may-alias: {0,1,2}]   ;;  %s3578_s1 = inlined_call_operand.vmem [shape: f32[2,4,512], index: 1, kind: input, shape index: {}, may-alias: {0,1,2}]   ;;  %s3579_s2 = inlined_call_operand.vmem [shape: f32[2,4,512], index: 2, kind: input, shape index: {}, may-alias: {0,1,2}]   ;;  %s3580_s3 = inlined_call_operand.vmem [shape: f32[3,8,72], index: 3, kind: input, shape index: {}]   ;;  %s3581_s4 = inlined_call_operand.vmem [shape: f32[8,1], index: 4, kind: input, shape index: {}]   ;;  %s3582_s5 = inlined_call_operand.vmem [shape: f32[4,8], index: 5, kind: input, shape index: {}]   ;;  %s3583_s6 = inlined_call_operand.vmem [shape: f32[4,1], index: 6, kind: input, shape index: {}]   ;;  %s3584_s7 = inlined_call_operand.vmem [shape: f32[2,4,512], index: 7, kind: output, shape index: {}]  }
   0x1   :  { %s2656_s26 = smov 0  }
   0x2 LB: > { %s29_s27 = sadd.s32 1, %s2587_s25  ;;  %p2086_p0 = scmp.ge.s32.totalorder %s2591_s26, 1  ;;  %s2591_s26 = sphi %s2656_s26, %s17_s26   ;;  %s2587_s25 = sphi %s2654_s25, %s3819_s25   ;;  %s2583_s24 = sphi %s2652_s24, %s3818_s24  }
   0x3   : > { %p31_p1 = scmp.ge.s32.totalorder %s29_s27, 2  ;;  %p316_p2 = scmp.lt.s32.totalorder %s2591_s26, 3 }
   0x5   : > { %s3821_s27 = smov (%p31_p1, %s29_s27), 0  ;;  %p317_p3 = pnand %p2086_p0, %p316_p2 }
   0x7   : > { %320 = sbr.rel (%p317_p3) target bundleno = 848 (0x350), region = 48 }
   0xe   : > { %p381_p4 = scmp.lt.s32.totalorder %s2583_s24, 1  ;;  %v3630_v0 = vmov 0.0   ;;  %s2594_s15 = smov 64   ;;  %vm452_vm0 = vcmask 519168   ;;  %vm466_vm1 = vcmask 523264   ;;  %vm475_vm2 = vcmask 1043968  }
   0xf   : > { %486 = vst [vmem:[#allocation2] sm:$0xf0] %v3630_v0  ;;  %487 = vst [vmem:[#allocation2 + $0x8] sm:$0xf0] %v3630_v0  ;;  %1077 = vmatprep.mubr.f32.mxu1 %v3630_v0  ;;  %1006 = vmatprep.mubr.f32.mxu0 %v3630_v0  ;;  %s2595_s16 = smov 9   ;;  %s2596_s17 = smov 8   ;;  %v496_v31 = vlaneseq }
  0x10   : > { %488 = vst [vmem:[#allocation2 + $0x10] sm:$0xf0] %v3630_v0  ;;  %489 = vst [vmem:[#allocation2 + $0x18] sm:$0xf0] %v3630_v0  ;;  %s3823_s24 = smov (!%p381_p4, %s2583_s24), 1  ;;  %s2597_s18 = smov 7  }
  0x11   : > { %490 = vst [vmem:[#allocation2 + $0x20] sm:$0xf0] %v3630_v0  ;;  %s2677_s28 = sshll.u32 %s3823_s24, 4  ;;  %s2598_s19 = smov 1   ;;  %v2737_v32 = vand.u32 127, %v496_v31  ;;  %v3637_v53 = vmov 0 }
  0x12   : > { %s2683_s8 = scalar_lea.vmem %s3577_s0, %s2677_s28  ;;  %s401_s11 = scalar_lea.vmem %s3578_s1, %s2677_s28  ;;  %v3641_v59 = vmov 0  ;;  %v3643_v60 = vmov 0  ;;  %v3645_v62 = vmov 0 }
  0x13   : > { %v437_v1 = vld [vmem:[%s2683_s8 + $0x8] sm:$0xff]  ;;  %v436_v2 = vld [vmem:[%s2683_s8] sm:$0xff]  ;;  %s417_s14 = scalar_lea.vmem %s3579_s2, %s2677_s28  ;;  %s2599_s20 = smov 127   ;;  %v498_v33 = vadd.s32 128, %v2737_v32  ;;  %v500_v35 = vadd.s32 384, %v2737_v32  ;;  %v499_v36 = vadd.s32 256, %v2737_v32 }
  0x14   : > { %v440_v3 = vld [vmem:[%s401_s11 + $0xc] sm:$0xf]  ;;  %v439_v4 = vmax.f32 %v437_v1, 0.0  ;;  %v438_v5 = vmax.f32 %v436_v2, 0.0  ;;  %v444_v7 = vld [vmem:[%s417_s14] sm:$0xf] }
  0x15   : > { %v441_v6 = vmax.f32 %v440_v3, 0.0  ;;  %v445_v10 = vmax.f32 %v444_v7, 0.0  ;;  %s2600_s21 = smov 121   ;;  %s2601_s22 = smov 120   ;;  %v502_v34 = vand.u32 63, %v498_v33  ;;  %v504_v39 = vand.u32 63, %v500_v35 }
  0x16   : > { %462 = vrot.lane.b32.xlu1 %v439_v4, %s2594_s15  ;;  %458 = vrot.lane.b32.xlu0 %v438_v5, %s2594_s15  ;;  %v456_v8 = vcombine.high %v438_v5, %v438_v5  ;;  %v457_v11 = vcombine.high %v439_v4, %v439_v4  ;;  %s2602_s23 = smov 119   ;;  %s2603_s24 = smov 73   ;;  %v503_v40 = vand.u32 63, %v499_v36  ;;  %v501_v44 = vand.u32 63, %v2737_v32 }
  0x17   : > { %v443_v9 = vmul.f32 0.0, %v441_v6  ;;  %v447_v12 = vmul.f32 0.0, %v445_v10  ;;  %s2604_s29 = smov 72   ;;  %s2605_s30 = smov 71   ;;  %v2745_v37 = vshra.s32 %v502_v34, 3  ;;  %v510_v38 = vand.u32 7, %v502_v34 }
  0x18   : > { %s2606_s9 = smov 65   ;;  %s2607_s10 = smov 63   ;;  %v2749_v43 = vshra.s32 %v504_v39, 3  ;;  %v512_v45 = vand.u32 7, %v504_v39  ;;  %v2754_v46 = vshra.s32 %v503_v40, 3  ;;  %v511_v47 = vand.u32 7, %v503_v40 }
  0x19   : > { %s2608_s11 = smov 57   ;;  %s2609_s12 = smov 56   ;;  %v514_v41 = vadd.s32 4294967295, %v2745_v37  ;;  %v530_v42 = vadd.s32 4294967295, %v510_v38  ;;  %v2757_v49 = vshra.s32 %v501_v44, 3  ;;  %v2770_v55 = vand.u32 7, %v501_v44 }
  0x1a   : > { %449 = vrot.lane.b32.xlu0 %v443_v9, %s2594_s15  ;;  %460 = vrot.lane.b32.xlu1 %v456_v8, %s2594_s15  ;;  %s2610_s13 = smov 55   ;;  %v516_v48 = vadd.s32 4294967295, %v2749_v43  ;;  %v532_v50 = vadd.s32 4294967295, %v512_v45  ;;  %v515_v52 = vadd.s32 4294967295, %v2754_v46  ;;  %v531_v54 = vadd.s32 4294967295, %v511_v47  ;;  %v1770_v8 = vld [vmem:[%s3581_s4] sm:$0xff] }
  0x1b   : > { %vm518_vm3 = vcmp.ge.s32.totalorder %v514_v41, 0  ;;  %vm522_vm4 = vcmp.lt.s32.totalorder %v514_v41, 8  ;;  %vm534_vm5 = vcmp.ge.s32.totalorder %v530_v42, 0  ;;  %vm538_vm6 = vcmp.lt.s32.totalorder %v530_v42, 8 }
  0x1c   : > { %vm2761_vm7 = vmand %vm518_vm3, %vm522_vm4  ;;  %vm520_vm9 = vcmp.ge.s32.totalorder %v516_v48, 0  ;;  %vm524_vm10 = vcmp.lt.s32.totalorder %v516_v48, 8  ;;  %v513_v56 = vadd.s32 4294967295, %v2757_v49  ;;  %vm536_vm11 = vcmp.ge.s32.totalorder %v532_v50, 0 }
  0x1d   : > { %vm2766_vm8 = vmand %vm534_vm5, %vm538_vm6  ;;  %vm540_vm12 = vcmp.lt.s32.totalorder %v532_v50, 8  ;;  %vm519_vm14 = vcmp.ge.s32.totalorder %v515_v52, 0  ;;  %vm523_vm15 = vcmp.lt.s32.totalorder %v515_v52, 8  ;;  %v2784_v58 = vadd.s32 4294967295, %v2770_v55 }
  0x1e   : > { %464 = vrot.lane.b32.xlu0 %v457_v11, %s2594_s15  ;;  %482 = vrot.lane.b32.xlu1 %v447_v12, %s2594_s15  ;;  %v3638_v53 = vsel %vm2766_vm8, 4294967295, %v3637_v53  ;;  %vm546_vm13 = vmand %vm2761_vm7, %vm2766_vm8  ;;  %vm517_vm4 = vcmp.ge.s32.totalorder %v513_v56, 0  ;;  %vm521_vm5 = vcmp.lt.s32.totalorder %v513_v56, 8  ;;  %v566_v61 = vadd.s32 1, %v510_v38 }
  0x1f   : > { %vm2786_vm3 = vmand %vm536_vm11, %vm540_vm12  ;;  %v568_v63 = vadd.s32 1, %v512_v45  ;;  %v3647_v1 = vmov 0  ;;  %v3649_v2 = vmov 0  ;;  %vm3587_vm12 = vcmp.ge.s32.totalorder %v2784_v58, 0 }
  0x20   : > { %v3642_v59 = vsel %vm2786_vm3, 4294967295, %v3641_v59  ;;  %vm2790_vm6 = vmand %vm519_vm14, %vm523_vm15  ;;  %v3653_v7 = vmov 0  ;;  %v3655_v11 = vmov 0  ;;  %v3676_v35 = vmov 0 }
  0x21   : > { %v3644_v60 = vsel %vm2790_vm6, 4294967295, %v3643_v60  ;;  %vm2804_vm11 = vmand %vm517_vm4, %vm521_vm5  ;;  %vm3658_vm4 = vcmp.ge.s32.totalorder %v566_v61, 0  ;;  %v3683_v41 = vmov 0  ;;  %v3686_v42 = vmov 0 }
  0x22   : > { %v3650_v2 = vsel %vm2804_vm11, 4294967295, %v3649_v2  ;;  %v3689_v50 = vmov 0  ;;  %v2956_v51 = vadd.s32 1, %v2770_v55  ;;  %v612_v57 = vadd.s32 1, %v2749_v43 }
  0x88   : > { %v463_v13 = vpop.permute.xlu1 %462  ;;  %v459_v14 = vpop.permute.xlu0 %458 }
  0x8c   : > { %v450_v15 = vpop.permute.xlu0 %449  ;;  %v461_v16 = vpop.permute.xlu1 %460 }
  0x8d   : > { %453 = vst.msk [vmem:[#allocation2] sm:$0xf] %vm452_vm0, %v450_v15  ;;  %v467_v17 = vsel %vm466_vm1, %v459_v14, %v461_v16  ;;  %v468_v18 = vsel %vm466_vm1, %v461_v16, %v463_v13 }
  0x8e   : > { %476 = vst.msk [vmem:[#allocation2] sm:$0xf] %vm475_vm2, %v459_v14  ;;  %477 = vst [vmem:[#allocation2 + $0x8] sm:$0xf] %v467_v17  ;;  %v2611_v14 = vmov 0   ;;  %v3661_v17 = vmov 0 }
  0x8f   : > { %478 = vst [vmem:[#allocation2 + $0x10] sm:$0xf] %v468_v18  ;;  %2564 = vset.pattern.permute.xlu1 %v2611_v14  ;;  %2565 = vset.pattern.permute.xlu0 %v2611_v14  ;;  %v3665_v18 = vmov 0 }
  0x90   : > { %v465_v19 = vpop.permute.xlu0 %464  ;;  %v483_v20 = vpop.permute.xlu1 %482 }
  0x91   : > { %v469_v21 = vsel %vm466_vm1, %v463_v13, %v465_v19  ;;  %480 = vst.msk [vmem:[#allocation2 + $0x20] sm:$0xf] %vm452_vm0, %v465_v19  ;;  %vm2779_vm0 = vmand %vm520_vm9, %vm524_vm10  ;;  %vm535_vm1 = vcmp.ge.s32.totalorder %v531_v54, 0  ;;  %v567_v13 = vadd.s32 1, %v511_v47  ;;  %v3669_v19 = vmov 0 }
  0x92   : > { %479 = vst [vmem:[#allocation2 + $0x18] sm:$0xf] %v469_v21  ;;  %485 = vst.msk [vmem:[#allocation2 + $0x20] sm:$0xf] %vm475_vm2, %v483_v20  ;;  %vm539_vm2 = vcmp.lt.s32.totalorder %v531_v54, 8 }
  0x93   : > { %vm2794_vm9 = vmand %vm535_vm1, %vm539_vm2  ;;  %vm3657_vm1 = vcmp.lt.s32.totalorder %v566_v61, 8 }
  0x94   : > { %v3646_v62 = vsel %vm2794_vm9, 4294967295, %v3645_v62  ;;  %vm2800_vm10 = vmpackc.low %vm2761_vm7, %vm546_vm13 }
  0x95   : > { %v2701_v22 = vld [vmem:[#allocation2] sm:$0xff]  ;;  %v2703_v23 = vld [vmem:[#allocation2 + $0x8] sm:$0xff]  ;;  %v3648_v1 = vsel %vm2800_vm10, 4294967295, %v3647_v1  ;;  %vm548_vm14 = vmand %vm2779_vm0, %vm2786_vm3  ;;  %vm3663_vm3 = vcmp.lt.s32.totalorder %v2745_v37, 8 }
  0x96   : > { %v2414_v24 = vpack.i.bf16 %v2703_v23, %v2701_v22  ;;  %v2707_v25 = vld [vmem:[#allocation2 + $0x10] sm:$0xff]  ;;  %vm547_vm13 = vmand %vm2790_vm6, %vm2794_vm9  ;;  %vm3668_vm9 = vcmp.ge.s32.totalorder %v568_v63, 0 }
  0x97   : > { %v2454_v29 = vpack.i.bf16 %v2707_v25, %v2703_v23  ;;  %vm2823_vm2 = vmand %vm2804_vm11, %vm3587_vm12  ;;  %vm3667_vm12 = vcmp.lt.s32.totalorder %v568_v63, 8 }
  0x98   : > { %2415 = vrot.lane.b32.xlu0 %v2414_v24, %s2595_s16  ;;  %vm2833_vm15 = vmpackc.low %vm2779_vm0, %vm548_vm14 }
  0x99   : > { %v2709_v26 = vld [vmem:[#allocation2 + $0x18] sm:$0xff]  ;;  %v2713_v28 = vld [vmem:[#allocation2 + $0x20] sm:$0xff]  ;;  %v3654_v7 = vsel %vm2833_vm15, 4294967295, %v3653_v7  ;;  %vm2849_vm14 = vmpackc.low %vm2790_vm6, %vm547_vm13  ;;  %vm3678_vm6 = vcmp.lt.s32.totalorder %v2737_v32, 8 }
  0x9a   : > { %v2419_v27 = vpack.i.bf16 %v2709_v26, %v2707_v25  ;;  %v2459_v30 = vpack.i.bf16 %v2713_v28, %v2709_v26  ;;  %v3656_v11 = vsel %vm2849_vm14, 4294967295, %v3655_v11  ;;  %vm2855_vm5 = vmand %vm3658_vm4, %vm3657_vm1  ;;  %vm3664_vm1 = vcmp.ge.s32.totalorder %v2745_v37, 0 }
  0x9b   : > { %vm2863_vm13 = vmpackc.low %vm2804_vm11, %vm2823_vm2  ;;  %vm575_vm2 = vcmp.lt.s32.totalorder %v567_v13, 8  ;;  %vm591_vm11 = vcmp.lt.s32.totalorder %v2754_v46, 8 }
  0x9c   : > { %2420 = vrot.lane.b32.xlu1 %v2419_v27, %s2595_s16  ;;  %2425 = vrot.lane.b32.xlu0 %v2414_v24, %s2596_s17  ;;  %v3662_v17 = vsel %vm2863_vm13, 4294967295, %v3661_v17  ;;  %vm2871_vm4 = vmand %vm3664_vm1, %vm3663_vm3  ;;  %vm3671_vm13 = vcmp.lt.s32.totalorder %v2737_v32, 9  ;;  %vm3672_vm3 = vcmp.lt.s32.totalorder %v2737_v32, 8  ;;  %vm3674_vm1 = vcmp.lt.s32.totalorder %v2749_v43, 8 }
  0x9d   : > { %v3666_v18 = vsel %vm2871_vm4, 4294967295, %v3665_v18  ;;  %vm2877_vm14 = vmand %vm3668_vm9, %vm3667_vm12 }
  0x9e   : > { %v3670_v19 = vsel %vm2877_vm14, 4294967295, %v3669_v19  ;;  %vm3680_vm14 = vmmov %vm3678_vm6 }
  0xa0   : > { %2430 = vrot.lane.b32.xlu1 %v2419_v27, %s2596_s17  ;;  %645 = vrot.lane.b32.xlu0 %v2713_v28, %s2595_s16 }
  0xa4   : > { %676 = vrot.lane.b32.xlu1 %v2713_v28, %s2596_s17  ;;  %2435 = vrot.lane.b32.xlu0 %v2414_v24, %s2597_s18 }
  0xa8   : > { %2440 = vrot.lane.b32.xlu1 %v2419_v27, %s2597_s18  ;;  %2445 = vrot.lane.b32.xlu0 %v2414_v24, %s2598_s19 }
  0xac   : > { %2450 = vrot.lane.b32.xlu1 %v2419_v27, %s2598_s19  ;;  %707 = vrot.lane.b32.xlu0 %v2713_v28, %s2597_s18 }
  0xb0   : > { %738 = vrot.lane.b32.xlu1 %v2713_v28, %s2598_s19  ;;  %2455 = vrot.lane.b32.xlu0 %v2454_v29, %s2599_s20 }
  0xb4   : > { %2460 = vrot.lane.b32.xlu1 %v2459_v30, %s2599_s20  ;;  %777 = vrot.lane.b32.xlu0 %v2701_v22, %s2599_s20 }
  0xb8   : > { %2465 = vrot.lane.b32.xlu1 %v2454_v29, %s2600_s21  ;;  %2470 = vrot.lane.b32.xlu0 %v2459_v30, %s2600_s21 }
  0xbc   : > { %2475 = vrot.lane.b32.xlu1 %v2454_v29, %s2601_s22  ;;  %2480 = vrot.lane.b32.xlu0 %v2459_v30, %s2601_s22 }
  0xc0   : > { %808 = vrot.lane.b32.xlu1 %v2701_v22, %s2600_s21  ;;  %839 = vrot.lane.b32.xlu0 %v2701_v22, %s2601_s22 }
  0xc4   : > { %872 = vrot.lane.b32.xlu1 %v2703_v23, %s2602_s23  ;;  %874 = vrot.lane.b32.xlu0 %v2707_v25, %s2602_s23 }
  0xc8   : > { %876 = vrot.lane.b32.xlu1 %v2709_v26, %s2602_s23  ;;  %878 = vrot.lane.b32.xlu0 %v2713_v28, %s2602_s23 }
  0xcc   : > { %2485 = vrot.lane.b32.xlu1 %v2454_v29, %s2603_s24  ;;  %2490 = vrot.lane.b32.xlu0 %v2459_v30, %s2603_s24 }
  0xd0   : > { %2495 = vrot.lane.b32.xlu1 %v2454_v29, %s2604_s29  ;;  %2500 = vrot.lane.b32.xlu0 %v2459_v30, %s2604_s29 }
  0xd4   : > { %870 = vrot.lane.b32.xlu1 %v2701_v22, %s2602_s23  ;;  %1088 = vrot.lane.b32.xlu0 %v2701_v22, %s2603_s24 }
  0xd8   : > { %1112 = vrot.lane.b32.xlu1 %v2701_v22, %s2604_s29  ;;  %2505 = vrot.lane.b32.xlu0 %v2454_v29, %s2605_s30 }
  0xdc   : > { %2510 = vrot.lane.b32.xlu1 %v2459_v30, %s2605_s30  ;;  %2515 = vrot.lane.b32.xlu0 %v2454_v29, %s2606_s9 }
  0xe0   : > { %2520 = vrot.lane.b32.xlu1 %v2459_v30, %s2606_s9  ;;  %1135 = vrot.lane.b32.xlu0 %v2701_v22, %s2605_s30 }
  0xe4   : > { %1158 = vrot.lane.b32.xlu1 %v2701_v22, %s2606_s9  ;;  %2525 = vrot.lane.b32.xlu0 %v2454_v29, %s2594_s15 }
  0xe8   : > { %2530 = vrot.lane.b32.xlu1 %v2459_v30, %s2594_s15  ;;  %2535 = vrot.lane.b32.xlu0 %v2454_v29, %s2607_s10 }
  0xec   : > { %2540 = vrot.lane.b32.xlu1 %v2459_v30, %s2607_s10  ;;  %1181 = vrot.lane.b32.xlu0 %v2701_v22, %s2594_s15 }
  0xf0   : > { %1204 = vrot.lane.b32.xlu1 %v2701_v22, %s2607_s10  ;;  %2545 = vrot.lane.b32.xlu0 %v2454_v29, %s2608_s11  ;;  %s430_s10 = scalar_lea.vmem %s3584_s7, %s2677_s28 }
  0xf4   : > { %2550 = vrot.lane.b32.xlu1 %v2459_v30, %s2608_s11  ;;  %2555 = vrot.lane.b32.xlu0 %v2454_v29, %s2609_s12 }
  0xf8   : > { %2560 = vrot.lane.b32.xlu1 %v2459_v30, %s2609_s12  ;;  %1227 = vrot.lane.b32.xlu0 %v2701_v22, %s2608_s11 }
  0xfc   : > { %1250 = vrot.lane.b32.xlu1 %v2701_v22, %s2609_s12  ;;  %1275 = vrot.lane.b32.xlu0 %v2703_v23, %s2610_s13 }
 0x100   : > { %1277 = vrot.lane.b32.xlu1 %v2707_v25, %s2610_s13  ;;  %1279 = vrot.lane.b32.xlu0 %v2709_v26, %s2610_s13 }
 0x104   : > { %1281 = vrot.lane.b32.xlu1 %v2713_v28, %s2610_s13  ;;  %1273 = vrot.lane.b32.xlu0 %v2701_v22, %s2610_s13 }
 0x108   : > { %1773 = vperm.xlu1 %2564, %v1770_v8  }
 0x10a   : > { %v2809_v3 = vpop.permute.xlu0 %2415 }
 0x10b   : > { %v2418_v5 = vunpack.i.h.bf16 %v2809_v3  ;;  %v2417_v6 = vunpack.i.l.bf16 %v2809_v3 }
 0x10d   : > { %v650_v24 = vsel %vm3671_vm13, %v2417_v6, %v2418_v5 }
 0x10e   : > { %v2426_v9 = vpop.permute.xlu0 %2425  ;;  %v2421_v10 = vpop.permute.xlu1 %2420 }
 0x10f   : > { %v2428_v15 = vunpack.i.h.bf16 %v2426_v9  ;;  %v2427_v16 = vunpack.i.l.bf16 %v2426_v9  ;;  %v2423_v20 = vunpack.i.h.bf16 %v2421_v10  ;;  %v2422_v21 = vunpack.i.l.bf16 %v2421_v10 }
 0x110   : > { %v3708_v10 = vmov 0 }
 0x111   : > { %v681_v27 = vsel %vm3672_vm3, %v2427_v16, %v2428_v15  ;;  %vm3673_vm3 = vmmov %vm3671_vm13  ;;  %vm3675_vm13 = vcmp.ge.s32.totalorder %v2749_v43, 0 }
 0x112   : > { %v646_v28 = vpop.permute.xlu0 %645  ;;  %v2431_v29 = vpop.permute.xlu1 %2430  ;;  %v2891_v30 = vpack.c.bf16 %v681_v27, %v650_v24  ;;  %vm2914_vm12 = vmand %vm3675_vm13, %vm3674_vm1  ;;  %v648_v36 = vsel %vm3673_vm3, %v2422_v21, %v2423_v20 }
 0x113   : > { %v2900_v31 = vsel %vm3673_vm3, %v2423_v20, %v646_v28  ;;  %v2433_v33 = vunpack.i.h.bf16 %v2431_v29  ;;  %v2432_v34 = vunpack.i.l.bf16 %v2431_v29  ;;  %v3677_v35 = vsel %vm2914_vm12, 4294967295, %v3676_v35  ;;  %vm3679_vm9 = vmmov %vm3673_vm3 }
 0x114   : > { %2221 = vmatprep.subr.msk.bf16.mxu0 %vm2800_vm10, %v2891_v30  ;;  %v649_v39 = vsel %vm3679_vm9, %v2418_v5, %v2422_v21  ;;  %vm3681_vm1 = vmand %vm2761_vm7, %vm2855_vm5  ;;  %vm3688_vm7 = vcmp.ge.s32.totalorder %v2754_v46, 0 }
 0x115   : > { %v679_v38 = vsel %vm3678_vm6, %v2432_v34, %v2433_v33  ;;  %v680_v40 = vsel %vm3680_vm14, %v2428_v15, %v2432_v34  ;;  %vm3682_vm13 = vmand %vm2871_vm4, %vm2766_vm8  ;;  %vm3685_vm6 = vcmp.ge.s32.totalorder %v567_v13, 0  ;;  %vm3704_vm8 = vcmp.ge.s32.totalorder %v2757_v49, 0 }
 0x116   : > { %vm2936_vm3 = vmpackc.low %vm3682_vm13, %vm3681_vm1  ;;  %v2436_v44 = vpop.permute.xlu0 %2435  ;;  %v677_v45 = vpop.permute.xlu1 %676  ;;  %v2945_v47 = vpack.c.bf16 %v679_v38, %v648_v36  ;;  %v2947_v48 = vpack.c.bf16 %v680_v40, %v649_v39  ;;  %vm3694_vm13 = vnez %v3642_v59  ;;  %v610_v13 = vadd.s32 1, %v2745_v37 }
 0x117   : > { %v3684_v41 = vsel %vm2936_vm3, 4294967295, %v3683_v41  ;;  %vm2941_vm10 = vmand %vm3685_vm6, %vm575_vm2  ;;  %vm3695_vm6 = vnez %v3644_v60  ;;  %v2438_v63 = vunpack.i.h.bf16 %v2436_v44  ;;  %v2437_v3 = vunpack.i.l.bf16 %v2436_v44 }
 0x118   : > { %v3687_v42 = vsel %vm2941_vm10, 4294967295, %v3686_v42  ;;  %vm2951_vm14 = vmand %vm3688_vm7, %vm591_vm11  ;;  %2245 = vmatprep.subr.msk.bf16.mxu1 %vm2833_vm15, %v2945_v47  ;;  %vm3697_vm11 = vnez %v3646_v62  ;;  %vm3698_vm7 = vnez %v3662_v17  ;;  %vm3613_vm3 = vcmp.lt.s32.totalorder %v2956_v51, 8 }
 0x119   : > { %v3690_v50 = vsel %vm2951_vm14, 4294967295, %v3689_v50  ;;  %vm3691_vm2 = vmmov %vm3679_vm9  ;;  %vm3692_vm9 = vcmp.lt.s32.totalorder %v2737_v32, 8  ;;  %v3724_v39 = vmov 0 }
 0x11a   : > { %v651_v52 = vsel %vm3691_vm2, %v646_v28, %v2417_v6  ;;  %v682_v54 = vsel %vm3692_vm9, %v677_v45, %v2427_v16  ;;  %vm3693_vm1 = vmmov %vm3692_vm9  ;;  %vm589_vm9 = vcmp.lt.s32.totalorder %v2757_v49, 8  ;;  %v2446_v4 = vpop.permute.xlu0 %2445  ;;  %v2441_v5 = vpop.permute.xlu1 %2440  ;;  %vm3699_vm2 = vnez %v3670_v19 }
 0x11b   : > { %v2964_v56 = vsel %vm3693_vm1, %v2433_v33, %v677_v45  ;;  %v2222_v61 = vpack.c.bf16 %v682_v54, %v651_v52  ;;  %vm3696_vm1 = vnez %v3656_v11  ;;  %vm599_vm15 = vmand %vm2951_vm14, %vm3697_vm11  ;;  %v3702_v6 = vmov 0 }
 0x11c   : > { %2248 = vmatpush1.bf16.msk.msra.mxu1 %vm3696_vm1, %v2947_v48  ;;  %vm3700_vm4 = vmand %vm2779_vm0, %vm3699_vm2  ;;  %v2448_v8 = vunpack.i.h.bf16 %v2446_v4  ;;  %v2447_v9 = vunpack.i.l.bf16 %v2446_v4  ;;  %v2443_v16 = vunpack.i.h.bf16 %v2441_v5  ;;  %v2442_v20 = vunpack.i.l.bf16 %v2441_v5 }
 0x11d   : > { %2224 = vmatpush1.bf16.msk.msra.mxu0 %vm3698_vm7, %v2222_v61  ;;  %vm3701_vm1 = vmand %vm2914_vm12, %vm3694_vm13  ;;  %vm618_vm14 = vcmp.lt.s32.totalorder %v610_v13, 8  ;;  %v3727_v61 = vmov 0 }
 0x11e   : > { %vm3002_vm11 = vmpackc.low %vm3701_vm1, %vm3700_vm4  ;;  %vm3710_vm4 = vcmp.lt.s32.totalorder %v2737_v32, 7  ;;  %vm3711_vm1 = vcmp.lt.s32.totalorder %v2737_v32, 1  ;;  %v708_v24 = vpop.permute.xlu0 %707  ;;  %v2451_v37 = vpop.permute.xlu1 %2450 }
 0x11f   : > { %v3703_v6 = vsel %vm3002_vm11, 4294967295, %v3702_v6  ;;  %vm3009_vm7 = vmand %vm3704_vm8, %vm589_vm9  ;;  %v712_v14 = vsel %vm3710_vm4, %v2437_v3, %v2438_v63  ;;  %v743_v15 = vsel %vm3711_vm1, %v2447_v9, %v2448_v8  ;;  %vm3712_vm8 = vnez %v3650_v2 }
 0x120   : > { %vm3707_vm0 = vmand %vm3695_vm6, %vm2941_vm10  ;;  %v3035_v21 = vpack.c.bf16 %v743_v15, %v712_v14  ;;  %v2453_v28 = vunpack.i.h.bf16 %v2451_v37  ;;  %v2452_v29 = vunpack.i.l.bf16 %v2451_v37  ;;  %v611_v15 = vadd.s32 1, %v2754_v46 }
 0x121   : > { %vm3018_vm13 = vmpackc.low %vm599_vm15, %vm3707_vm0  ;;  %vm3715_vm15 = vcmp.ge.s32.totalorder %v2784_v58, 0  ;;  %v609_v46 = vadd.s32 1, %v2757_v49  ;;  %v3739_v49 = vmov 0 }
 0x122   : > { %v3709_v10 = vsel %vm3018_vm13, 4294967295, %v3708_v10  ;;  %vm3031_vm9 = vmand %vm3712_vm8, %vm3613_vm3  ;;  %vm3718_vm8 = vnez %v3684_v41  ;;  %v741_v36 = vsel %vm3711_vm1, %v2452_v29, %v2453_v28  ;;  %v2456_v52 = vpop.permute.xlu0 %2455  ;;  %v739_v54 = vpop.permute.xlu1 %738 }
 0x123   : > { %vm597_vm6 = vmand %vm3009_vm7, %vm3715_vm15  ;;  %2227 = vmatprep.subr.msk.bf16.mxu0 %vm3718_vm8, %v3035_v21  ;;  %v3096_v5 = vsel %vm3711_vm1, %v2453_v28, %v739_v54 }
 0x124   : > { %vm3716_vm0 = vmmov %vm3710_vm4  ;;  %vm3717_vm4 = vnez %v3666_v18  ;;  %v3730_v18 = vmov 0 }
 0x125   : > { %v3043_v27 = vsel %vm3716_vm0, %v2443_v16, %v708_v24  ;;  %vm3056_vm15 = vmand %vm3009_vm7, %vm3613_vm3  ;;  %v713_v40 = vsel %vm3716_vm0, %v708_v24, %v2437_v3  ;;  %v2457_v3 = vunpack.i.l.bf16 %v2456_v52 }
 0x126   : > { %vm3721_vm10 = vmmov %vm3716_vm0  ;;  %v2461_v43 = vpop.permute.xlu1 %2460 }
 0x127   : > { %v710_v33 = vsel %vm3721_vm10, %v2442_v20, %v2443_v16  ;;  %vm3722_vm12 = vmmov %vm3716_vm0  ;;  %vm3614_vm10 = vcmp.lt.s32.totalorder %v2737_v32, 127  ;;  %v2463_v24 = vunpack.i.h.bf16 %v2461_v43  ;;  %v2462_v37 = vunpack.i.l.bf16 %v2461_v43 }
 0x128   : > { %v711_v34 = vsel %vm3722_vm12, %v2438_v63, %v2442_v20  ;;  %vm3723_vm8 = vmmov %vm3711_vm1  ;;  %v3076_v44 = vpack.c.bf16 %v741_v36, %v710_v33  ;;  %v2458_v63 = vunpack.i.h.bf16 %v2456_v52  ;;  %v778_v20 = vpop.permute.xlu0 %777 }
 0x129   : > { %v742_v38 = vsel %vm3723_vm8, %v2448_v8, %v2452_v29  ;;  %vm3070_vm3 = vmpackc.low %vm597_vm6, %vm3031_vm9  ;;  %v791_v60 = vsel %vm3614_vm10, %v778_v20, %v2457_v3 }
 0x12a   : > { %v3725_v39 = vsel %vm3070_vm3, 4294967295, %v3724_v39  ;;  %v3078_v45 = vpack.c.bf16 %v742_v38, %v711_v34  ;;  %vm3726_vm12 = vmand %vm3717_vm4, %vm2855_vm5  ;;  %2251 = vmatprep.subr.msk.bf16.mxu1 %vm3002_vm11, %v3076_v44  ;;  %v790_v16 = vsel %vm3614_vm10, %v2457_v3, %v2458_v63  ;;  %vm616_vm10 = vcmp.ge.s32.totalorder %v612_v57, 0  ;;  %v2466_v36 = vpop.permute.xlu1 %2465 }
 0x12b   : > { %vm3088_vm9 = vmpackc.low %vm3726_vm12, %vm3717_vm4  ;;  %vm3732_vm4 = vcmp.ge.s32.totalorder %v610_v13, 0  ;;  %v3129_v13 = vpack.c.bf16 %v790_v16, %v2703_v23  ;;  %vm3737_vm12 = vnez %v3690_v50  ;;  %v2234_v23 = vpack.c.bf16 %v791_v60, %v2701_v22 }
 0x12c   : > { %v3728_v61 = vsel %vm3088_vm9, 4294967295, %v3727_v61  ;;  %vm3729_vm6 = vmmov %vm3711_vm1  ;;  %2254 = vmatpush1.bf16.msk.msra.mxu1 %vm3018_vm13, %v3078_v45  ;;  %vm3738_vm1 = vnez %v3638_v53  ;;  %vm3741_vm11 = vcmp.lt.s32.totalorder %v2737_v32, 127  ;;  %vm619_vm13 = vcmp.lt.s32.totalorder %v611_v15, 8  ;;  %v2471_v34 = vpop.permute.xlu0 %2470 }
 0x12d   : > { %v744_v4 = vsel %vm3729_vm6, %v739_v54, %v2447_v9  ;;  %vm3102_vm8 = vmpackc.low %vm3056_vm15, %vm3009_vm7  ;;  %vm3735_vm7 = vnez %v3677_v35  ;;  %v3156_v28 = vsel %vm3741_vm11, %v2463_v24, %v778_v20  ;;  %v3745_v35 = vmov 0 }
 0x12e   : > { %v3731_v18 = vsel %vm3102_vm8, 4294967295, %v3730_v18  ;;  %v2228_v8 = vpack.c.bf16 %v744_v4, %v713_v40  ;;  %vm3113_vm0 = vmand %vm3732_vm4, %vm618_vm14  ;;  %vm3736_vm14 = vnez %v3687_v42  ;;  %v2472_v38 = vunpack.i.l.bf16 %v2471_v34  ;;  %v2476_v3 = vpop.permute.xlu1 %2475 }
 0x12f   : > { %vm608_vm15 = vmand %vm3735_vm7, %vm3699_vm2  ;;  %v2468_v40 = vunpack.i.h.bf16 %v2466_v36  ;;  %v2467_v52 = vunpack.i.l.bf16 %v2466_v36 }
 0x130   : > { %2230 = vmatpush1.bf16.msk.msra.mxu0 %vm3070_vm3, %v2228_v8  ;;  %vm3150_vm6 = vmpackc.low %vm608_vm15, %vm3735_vm7  ;;  %vm620_vm3 = vcmp.lt.s32.totalorder %v612_v57, 8  ;;  %v2478_v57 = vunpack.i.h.bf16 %v2476_v3 }
 0x131   : > { %2233 = vmatprep.subr.msk.bf16.mxu0 %vm3088_vm9, %v3129_v13  ;;  %v3740_v49 = vsel %vm3150_vm6, 4294967295, %v3739_v49  ;;  %vm3742_vm4 = vmmov %vm3741_vm11  ;;  %vm3765_vm9 = vcmp.lt.s32.totalorder %v2737_v32, 120 }
 0x132   : > { %v788_v22 = vsel %vm3742_vm4, %v2462_v37, %v2463_v24  ;;  %vm3743_vm2 = vmmov %vm3742_vm4  ;;  %vm617_vm4 = vcmp.lt.s32.totalorder %v609_v46, 8 }
 0x133   : > { %v789_v29 = vsel %vm3743_vm2, %v2458_v63, %v2462_v37  ;;  %vm3744_vm7 = vmand %vm3737_vm12, %vm3736_vm14  ;;  %v3174_v2 = vpack.c.bf16 %v788_v22, %v2709_v26  ;;  %v2473_v26 = vunpack.i.h.bf16 %v2471_v34  ;;  %v2481_v63 = vpop.permute.xlu0 %2480 }
 0x134   : > { %vm3169_vm15 = vmpackc.low %vm3744_vm7, %vm3737_vm12  ;;  %v3177_v33 = vpack.c.bf16 %v789_v29, %v2707_v25  ;;  %2236 = vmatpush1.bf16.msk.msra.mxu0 %vm3102_vm8, %v2234_v23  ;;  %vm613_vm12 = vcmp.ge.s32.totalorder %v609_v46, 0  ;;  %v2483_v4 = vunpack.i.h.bf16 %v2481_v63  ;;  %v2482_v8 = vunpack.i.l.bf16 %v2481_v63  ;;  %v809_v29 = vpop.permute.xlu1 %808  ;;  %v901_v25 = vld [vmem:[%s3580_s3] sm:$0xff] }
 0x135   : > { %v3746_v35 = vsel %vm3169_vm15, 4294967295, %v3745_v35  ;;  %vm3747_vm11 = vmand %vm3113_vm0, %vm3738_vm1  ;;  %2257 = vmatprep.subr.msk.bf16.mxu1 %vm3150_vm6, %v3174_v2  ;;  %vm3752_vm1 = vcmp.ge.s32.totalorder %v611_v15, 0  ;;  %v2477_v15 = vunpack.i.l.bf16 %v2476_v3  ;;  %vm3758_vm8 = vnez %v3646_v62 }
 0x136   : > { %vm3188_vm2 = vmpackc.low %vm3113_vm0, %vm3747_vm11  ;;  %2260 = vmatpush1.bf16.msk.msra.mxu1 %vm3169_vm15, %v3177_v33  ;;  %vm3761_vm15 = vcmp.ge.s32.totalorder %v2784_v58, 0  ;;  %v850_v43 = vsel %vm3765_vm9, %v2482_v8, %v2483_v4 }
 0x137   : > { %vm3194_vm7 = vmand %vm616_vm10, %vm620_vm3  ;;  %v840_v22 = vpop.permute.xlu0 %839 }
 0x138   : > { %vm3202_vm11 = vmand %vm3752_vm1, %vm619_vm13  ;;  %vm3757_vm13 = vnez %v3642_v59 }
 0x139   : > { %vm3210_vm3 = vmand %vm613_vm12, %vm617_vm4  ;;  %vm3759_vm4 = vcmp.lt.s32.totalorder %v2737_v32, 121 }
 0x13a   : > { %vm628_vm1 = vmand %vm3194_vm7, %vm3757_vm13  ;;  %v819_v16 = vsel %vm3759_vm4, %v2472_v38, %v2473_v26 }
 0x13b   : > { %vm627_vm12 = vmand %vm3202_vm11, %vm3758_vm8  ;;  %v3249_v24 = vpack.c.bf16 %v850_v43, %v819_v16 }
 0x13c   : > { %vm3760_vm10 = vmmov %vm3759_vm4 }
 0x13d   : > { %v820_v20 = vsel %vm3760_vm10, %v2468_v40, %v2472_v38  ;;  %vm3231_vm13 = vmand %vm3210_vm3, %vm3761_vm15 }
 0x13e   : > { %vm3764_vm6 = vmmov %vm3759_vm4 }
 0x13f   : > { %v821_v62 = vsel %vm3764_vm6, %v2467_v52, %v2468_v40  ;;  %vm3766_vm8 = vmmov %vm3765_vm9 }
 0x140   : > { %v851_v46 = vsel %vm3766_vm8, %v2478_v57, %v2482_v8  ;;  %vm3767_vm4 = vmmov %vm3766_vm8 }
 0x141   : > { %v852_v60 = vsel %vm3767_vm4, %v2477_v15, %v2478_v57  ;;  %vm3245_vm10 = vmpackc.low %vm3194_vm7, %vm628_vm1  ;;  %v3253_v23 = vpack.c.bf16 %v851_v46, %v820_v20  ;;  %vm3774_vm1 = vcmp.lt.s32.totalorder %v2737_v32, 121  ;;  %v873_v57 = vpop.permute.xlu1 %872  ;;  %v3783_v20 = vmov 0 }
 0x142   : > { %v3251_v37 = vpack.c.bf16 %v852_v60, %v821_v62  ;;  %vm3257_vm9 = vmpackc.low %vm3202_vm11, %vm627_vm12  ;;  %v822_v40 = vsel %vm3774_vm1, %v809_v29, %v2467_v52  ;;  %2263 = vmatprep.subr.msk.bf16.mxu1 %vm3245_vm10, %v3249_v24  ;;  %v875_v52 = vpop.permute.xlu0 %874 }
 0x143   : > { %vm3772_vm6 = vmmov %vm3767_vm4  ;;  %2266 = vmatpush1.bf16.msk.msra.mxu1 %vm3257_vm9, %v3253_v23 }
 0x144   : > { %v853_v36 = vsel %vm3772_vm6, %v840_v22, %v2477_v15  ;;  %vm3773_vm15 = vmmov %vm3767_vm4  ;;  %2239 = vmatprep.subr.msk.bf16.mxu0 %vm3188_vm2, %v3251_v37  ;;  %vm880_vm4 = vcmp.lt.s32.totalorder %v2737_v32, 119  ;;  %vm3780_vm6 = vnez %v3670_v19 }
 0x145   : > { %v3265_v38 = vsel %vm3773_vm15, %v2483_v4, %v840_v22  ;;  %vm3775_vm8 = vmmov %vm3774_vm1  ;;  %v2240_v8 = vpack.c.bf16 %v853_v36, %v822_v40  ;;  %v3305_v15 = vsel %vm880_vm4, %v873_v57, %v875_v52  ;;  %v877_v16 = vpop.permute.xlu1 %876  ;;  %vm3786_vm15 = vcmp.lt.s32.totalorder %v2956_v51, 8 }
 0x146   : > { %v3271_v63 = vsel %vm3775_vm8, %v2473_v26, %v809_v29  ;;  %vm3277_vm12 = vmpackc.low %vm3210_vm3, %vm3231_vm13  ;;  %v879_v9 = vpop.permute.xlu0 %878  ;;  %v3332_v19 = vsel %vm880_vm4, %v875_v52, %v877_v16  ;;  %vm3790_vm8 = vnez %v3648_v1  ;;  %v3808_v1 = vpack.c.bf16 %v3096_v5, %v3043_v27 }
 0x147   : > { %vm3297_vm13 = vmand %vm3113_vm0, %vm2855_vm5  ;;  %2242 = vmatpush1.bf16.msk.msra.mxu0 %vm3277_vm12, %v2240_v8  ;;  %v3328_v59 = vsel %vm880_vm4, %v877_v16, %v879_v9 }
 0x148   : > { %2127 = vmatprep.subr.msk.mxu0 %vm3297_vm13, %v3305_v15  ;;  %vm3314_vm5 = vmand %vm3194_vm7, %vm3780_vm6  ;;  %3785 = vst [vmem:[#allocation5_spill] sm:$0xff] %v3328_v59  ;;  %vm3632_vm7 = vcmask 588800   ;;  %vm3791_vm6 = vnez %v3656_v11 }
 0x149   : > { %vm3322_vm0 = vmand %vm3202_vm11, %vm3736_vm14  ;;  %2145 = vmatprep.subr.msk.mxu1 %vm3314_vm5, %v3328_v59  ;;  %v2486_v53 = vpop.permute.xlu1 %2485  ;;  %vm1098_vm14 = vcmp.lt.s32.totalorder %v2737_v32, 73  ;;  %vm1122_vm11 = vcmp.lt.s32.totalorder %v2737_v32, 72 }
 0x14a   : > { %v3784_v20 = vsel %vm3322_vm0, 4294967295, %v3783_v20  ;;  %2146 = vmatpush1.msk.msra.mxu1 %vm3322_vm0, %v3332_v19  ;;  %v2491_v42 = vpop.permute.xlu0 %2490  ;;  %v2488_v46 = vunpack.i.h.bf16 %v2486_v53  ;;  %v2487_v60 = vunpack.i.l.bf16 %v2486_v53  ;;  %vm3361_vm1 = vmand %vm3210_vm3, %vm3786_vm15  ;;  %vm3789_vm3 = vnez %v3654_v7  ;;  %v2568_v7 = vld [vmem:[#allocation2 + $0x20] sm:$0xff] }
 0x14b   : > { %2096 = vmatmul.mubr.msk.f32.vlgmr.msra.gmra.mrb[0].mxu1 %vm3632_vm7, %v901_v25  ;;  %v2493_v62 = vunpack.i.h.bf16 %v2491_v42  ;;  %v2492_v43 = vunpack.i.l.bf16 %v2491_v42  ;;  %vm3793_vm15 = vnez %v3662_v17 }
 0x14c   : > { %1472 = vmatprep.mubr.f32.mxu1 %v3630_v0 }
 0x14d   : > { %v2496_v29 = vpop.permute.xlu1 %2495  ;;  %v1100_v16 = vsel %vm1098_vm14, %v2488_v46, %v2492_v43  ;;  %v1099_v4 = vsel %vm1098_vm14, %v2492_v43, %v2493_v62  ;;  %v1101_v62 = vsel %vm1098_vm14, %v2487_v60, %v2488_v46 }
 0x14e   : > { %v2501_v22 = vpop.permute.xlu0 %2500  ;;  %v2498_v8 = vunpack.i.h.bf16 %v2496_v29  ;;  %v2497_v52 = vunpack.i.l.bf16 %v2496_v29 }
 0x14f   : > { %v2503_v36 = vunpack.i.h.bf16 %v2501_v22  ;;  %v2502_v40 = vunpack.i.l.bf16 %v2501_v22 }
 0x150   : > { %v1125_v14 = vsel %vm1122_vm11, %v2497_v52, %v2498_v8 }
 0x151   : > { %v1123_v42 = vsel %vm1122_vm11, %v2502_v40, %v2503_v36  ;;  %v1124_v53 = vsel %vm1122_vm11, %v2498_v8, %v2502_v40  ;;  %v871_v36 = vpop.permute.xlu1 %870  ;;  %v2267_v0 = vpack.c.bf16 %v1125_v14, %v1101_v62 }
 0x152   : > { %v1089_v43 = vpop.permute.xlu0 %1088  ;;  %v2294_v29 = vpack.c.bf16 %v1124_v53, %v1100_v16  ;;  %v2291_v55 = vpack.c.bf16 %v1123_v42, %v1099_v4  ;;  %v884_v40 = vsel %vm880_vm4, %v871_v36, %v873_v57  ;;  %v3371_v51 = vsel %vm880_vm4, %v879_v9, %v871_v36 }
 0x153   : > { %2128 = vmatpush1.msk.msra.mxu0 %vm3361_vm1, %v884_v40  ;;  %v1102_v4 = vsel %vm1098_vm14, %v1089_v43, %v2487_v60  ;;  %v3792_v9 = vmov 0.0   ;;  %vm1168_vm4 = vcmp.lt.s32.totalorder %v2737_v32, 65  ;;  %vm3794_vm14 = vnez %v3684_v41 }
 0x154   : > { %2293 = vmatprep.subr.msk.bf16.mxu1 %vm3789_vm3, %v2291_v55  ;;  %2269 = vmatprep.subr.msk.bf16.mxu0 %vm3790_vm8, %v2267_v0 }
 0x155   : > { %2296 = vmatpush1.bf16.msk.msra.mxu1 %vm3791_vm6, %v2294_v29  ;;  %v1113_v54 = vpop.permute.xlu1 %1112  ;;  %2095 = vmatmul.mubr.msk.f32.vlgmr.msra.gmra.mrb[0].mxu0 %vm3632_vm7, %v901_v25  ;;  %vm1145_vm7 = vcmp.lt.s32.totalorder %v2737_v32, 71  ;;  %vm3796_vm6 = vnez %v3709_v10 }
 0x156   : > { %v2506_v14 = vpop.permute.xlu0 %2505  ;;  %v1126_v57 = vsel %vm1122_vm11, %v1113_v54, %v2497_v52  ;;  %1401 = vmatprep.mubr.f32.mxu0 %v3792_v9  ;;  %vm3795_vm11 = vnez %v3703_v6 }
 0x157   : > { %v2270_v46 = vpack.c.bf16 %v1126_v57, %v1102_v4  ;;  %v2508_v55 = vunpack.i.h.bf16 %v2506_v14  ;;  %v2507_v8 = vunpack.i.l.bf16 %v2506_v14 }
 0x159   : > { %v2511_v16 = vpop.permute.xlu1 %2510  ;;  %2272 = vmatpush1.bf16.msk.msra.mxu0 %vm3793_vm15, %v2270_v46  ;;  %v1148_v62 = vsel %vm1145_vm7, %v2507_v8, %v2508_v55  ;;  %vm3797_vm15 = vnez %v3725_v39 }
 0x15a   : > { %v2516_v0 = vpop.permute.xlu0 %2515  ;;  %v2513_v52 = vunpack.i.h.bf16 %v2511_v16  ;;  %v2512_v53 = vunpack.i.l.bf16 %v2511_v16 }
 0x15b   : > { %v2518_v25 = vunpack.i.h.bf16 %v2516_v0  ;;  %v2517_v42 = vunpack.i.l.bf16 %v2516_v0 }
 0x15c   : > { %v1147_v54 = vsel %vm1145_vm7, %v2508_v55, %v2512_v53  ;;  %v1146_v46 = vsel %vm1145_vm7, %v2512_v53, %v2513_v52 }
 0x15d   : > { %v1171_v60 = vsel %vm1168_vm4, %v2517_v42, %v2518_v25  ;;  %v2521_v29 = vpop.permute.xlu1 %2520 }
 0x15e   : > { %v1136_v43 = vpop.permute.xlu0 %1135  ;;  %v2273_v36 = vpack.c.bf16 %v1171_v60, %v1148_v62  ;;  %v2523_v40 = vunpack.i.h.bf16 %v2521_v29  ;;  %v2522_v14 = vunpack.i.l.bf16 %v2521_v29 }
 0x15f   : > { %v1149_v29 = vsel %vm1145_vm7, %v1136_v43, %v2507_v8  ;;  %vm1191_vm7 = vcmp.lt.s32.totalorder %v2737_v32, 64 }
 0x160   : > { %2275 = vmatprep.subr.msk.bf16.mxu0 %vm3794_vm14, %v2273_v36  ;;  %v1169_v4 = vsel %vm1168_vm4, %v2522_v14, %v2523_v40  ;;  %v1170_v57 = vsel %vm1168_vm4, %v2518_v25, %v2522_v14  ;;  %vm1214_vm14 = vcmp.lt.s32.totalorder %v2737_v32, 63 }
 0x161   : > { %v2300_v0 = vpack.c.bf16 %v1170_v57, %v1147_v54  ;;  %v1159_v60 = vpop.permute.xlu1 %1158  ;;  %v2297_v62 = vpack.c.bf16 %v1169_v4, %v1146_v46 }
 0x162   : > { %v2526_v16 = vpop.permute.xlu0 %2525  ;;  %v1172_v36 = vsel %vm1168_vm4, %v1159_v60, %v2517_v42  ;;  %vm3798_vm4 = vnez %v3728_v61 }
 0x163   : > { %v2276_v55 = vpack.c.bf16 %v1172_v36, %v1149_v29  ;;  %2299 = vmatprep.subr.msk.bf16.mxu1 %vm3795_vm11, %v2297_v62  ;;  %v2528_v40 = vunpack.i.h.bf16 %v2526_v16  ;;  %v2527_v59 = vunpack.i.l.bf16 %v2526_v16  ;;  %vm3801_vm11 = vnez %v3731_v18  ;;  %v1784_v18 = vld [vmem:[%s3582_s5] sm:$0xf] }
 0x164   : > { %2302 = vmatpush1.bf16.msk.msra.mxu1 %vm3796_vm6, %v2300_v0  ;;  %vm3799_vm6 = vnez %v3740_v49  ;;  %v1937_v49 = vld [vmem:[%s2683_s8] sm:$0xff] }
 0x165   : > { %v2531_v52 = vpop.permute.xlu1 %2530  ;;  %2278 = vmatpush1.bf16.msk.msra.mxu0 %vm3797_vm15, %v2276_v55  ;;  %v1194_v54 = vsel %vm1191_vm7, %v2527_v59, %v2528_v40  ;;  %vm1260_vm15 = vcmp.lt.s32.totalorder %v2737_v32, 56 }
 0x166   : > { %v2536_v25 = vpop.permute.xlu0 %2535  ;;  %v2533_v43 = vunpack.i.h.bf16 %v2531_v52  ;;  %v2532_v14 = vunpack.i.l.bf16 %v2531_v52 }
 0x167   : > { %v2538_v8 = vunpack.i.h.bf16 %v2536_v25  ;;  %v2537_v42 = vunpack.i.l.bf16 %v2536_v25 }
 0x168   : > { %v1193_v60 = vsel %vm1191_vm7, %v2528_v40, %v2532_v14  ;;  %v1192_v36 = vsel %vm1191_vm7, %v2532_v14, %v2533_v43 }
 0x169   : > { %v1217_v53 = vsel %vm1214_vm14, %v2537_v42, %v2538_v8  ;;  %v2541_v57 = vpop.permute.xlu1 %2540 }
 0x16a   : > { %v1182_v4 = vpop.permute.xlu0 %1181  ;;  %v2279_v46 = vpack.c.bf16 %v1217_v53, %v1194_v54  ;;  %v2543_v0 = vunpack.i.h.bf16 %v2541_v57  ;;  %v2542_v16 = vunpack.i.l.bf16 %v2541_v57 }
 0x16b   : > { %v1195_v54 = vsel %vm1191_vm7, %v1182_v4, %v2527_v59  ;;  %vm1237_vm7 = vcmp.lt.s32.totalorder %v2737_v32, 57 }
 0x16c   : > { %2281 = vmatprep.subr.msk.bf16.mxu0 %vm3798_vm4, %v2279_v46  ;;  %v1215_v62 = vsel %vm1214_vm14, %v2542_v16, %v2543_v0  ;;  %v1216_v29 = vsel %vm1214_vm14, %v2538_v8, %v2542_v16  ;;  %vm3800_vm4 = vnez %v3746_v35 }
 0x16d   : > { %v2306_v55 = vpack.c.bf16 %v1216_v29, %v1193_v60  ;;  %v1205_v52 = vpop.permute.xlu1 %1204  ;;  %v2303_v53 = vpack.c.bf16 %v1215_v62, %v1192_v36 }
 0x16e   : > { %v2546_v25 = vpop.permute.xlu0 %2545  ;;  %v1218_v57 = vsel %vm1214_vm14, %v1205_v52, %v2537_v42  ;;  %vm1283_vm14 = vcmp.lt.s32.totalorder %v2737_v32, 55  ;;  %v2097_v32 = vld [vmem:[%s3580_s3 + $0x8] sm:$0xff] }
 0x16f   : > { %v2282_v40 = vpack.c.bf16 %v1218_v57, %v1195_v54  ;;  %2305 = vmatprep.subr.msk.bf16.mxu1 %vm3799_vm6, %v2303_v53  ;;  %v2548_v46 = vunpack.i.h.bf16 %v2546_v25  ;;  %v2547_v0 = vunpack.i.l.bf16 %v2546_v25 }
 0x170   : > { %2308 = vmatpush1.bf16.msk.msra.mxu1 %vm3800_vm4, %v2306_v55 }
 0x171   : > { %v2551_v43 = vpop.permute.xlu1 %2550  ;;  %2284 = vmatpush1.bf16.msk.msra.mxu0 %vm3801_vm11, %v2282_v40  ;;  %v1240_v60 = vsel %vm1237_vm7, %v2547_v0, %v2548_v46 }
 0x172   : > { %v2556_v8 = vpop.permute.xlu0 %2555  ;;  %v2553_v4 = vunpack.i.h.bf16 %v2551_v43  ;;  %v2552_v16 = vunpack.i.l.bf16 %v2551_v43 }
 0x173   : > { %v2558_v59 = vunpack.i.h.bf16 %v2556_v8  ;;  %v2557_v42 = vunpack.i.l.bf16 %v2556_v8 }
 0x174   : > { %v1239_v52 = vsel %vm1237_vm7, %v2548_v46, %v2552_v16  ;;  %v1238_v57 = vsel %vm1237_vm7, %v2552_v16, %v2553_v4 }
 0x175   : > { %v1263_v14 = vsel %vm1260_vm15, %v2557_v42, %v2558_v59  ;;  %v2561_v29 = vpop.permute.xlu1 %2560 }
 0x176   : > { %v1228_v62 = vpop.permute.xlu0 %1227  ;;  %v2285_v36 = vpack.c.bf16 %v1263_v14, %v1240_v60  ;;  %v2563_v55 = vunpack.i.h.bf16 %v2561_v29  ;;  %v2562_v25 = vunpack.i.l.bf16 %v2561_v29 }
 0x177   : > { %v1241_v60 = vsel %vm1237_vm7, %v1228_v62, %v2547_v0  ;;  %vm3804_vm7 = vnez %v3662_v17  ;;  %v2351_v17 = vpack.c.bf16 %v3156_v28, %v2568_v7  ;;  %v1938_v28 = vld [vmem:[%s2683_s8 + $0x8] sm:$0xff] }
 0x178   : > { %2287 = vmatprep.subr.msk.bf16.mxu0 %vm3188_vm2, %v2285_v36  ;;  %v1261_v53 = vsel %vm1260_vm15, %v2562_v25, %v2563_v55  ;;  %v1262_v54 = vsel %vm1260_vm15, %v2558_v59, %v2562_v25  ;;  %v3803_v25 = vpack.c.bf16 %v2964_v56, %v2900_v31  ;;  %v3815_v31 = vld [vmem:[#allocation5_spill] sm:$0xff] }
 0x179   : > { %v2312_v40 = vpack.c.bf16 %v1262_v54, %v1239_v52  ;;  %v1251_v43 = vpop.permute.xlu1 %1250  ;;  %v2309_v14 = vpack.c.bf16 %v1261_v53, %v1238_v57 }
 0x17a   : > { %v1276_v8 = vpop.permute.xlu0 %1275  ;;  %v1264_v29 = vsel %vm1260_vm15, %v1251_v43, %v2557_v42  ;;  %vm3802_vm15 = vcmask 588800  }
 0x17b   : > { %v2288_v46 = vpack.c.bf16 %v1264_v29, %v1241_v60  ;;  %2311 = vmatprep.subr.msk.bf16.mxu1 %vm3245_vm10, %v2309_v14 }
 0x17c   : > { %2314 = vmatpush1.bf16.msk.msra.mxu1 %vm3257_vm9, %v2312_v40 }
 0x17d   : > { %v1278_v4 = vpop.permute.xlu1 %1277  ;;  %2290 = vmatpush1.bf16.msk.msra.mxu0 %vm3277_vm12, %v2288_v46 }
 0x17e   : > { %v1280_v59 = vpop.permute.xlu0 %1279  ;;  %v1286_v16 = vsel %vm1283_vm14, %v1276_v8, %v1278_v4 }
 0x17f   : > { %2163 = vmatprep.subr.msk.mxu0 %vm3297_vm13, %v1286_v16  ;;  %v1285_v55 = vsel %vm1283_vm14, %v1278_v4, %v1280_v59 }
 0x181   : > { %v1282_v42 = vpop.permute.xlu1 %1281 }
 0x182   : > { %v1274_v0 = vpop.permute.xlu0 %1273  ;;  %v1284_v36 = vsel %vm1283_vm14, %v1280_v59, %v1282_v42 }
 0x183   : > { %v1287_v62 = vsel %vm1283_vm14, %v1274_v0, %v1276_v8  ;;  %2181 = vmatprep.subr.msk.mxu1 %vm3314_vm5, %v1284_v36  ;;  %vm3805_vm14 = vmmov %vm3802_vm15 }
 0x184   : > { %2164 = vmatpush1.msk.msra.mxu0 %vm3361_vm1, %v1287_v62  ;;  %2182 = vmatpush1.msk.msra.mxu1 %vm3322_vm0, %v1285_v55  ;;  %vm3806_vm0 = vnez %v3684_v41  ;;  %v1785_v41 = vld [vmem:[%s3583_s6] sm:$0xf] }
 0x185   : > { %2317 = vmatprep.subr.msk.bf16.mxu0 %vm3790_vm8, %v2947_v48  ;;  %2098 = vmatmul.mubr.msk.f32.vlgmr.msra.gmra.mrb[0].mxu0 %vm3802_vm15, %v2097_v32  ;;  %vm3807_vm8 = vnez %v3656_v11  ;;  %vm3809_vm15 = vnez %v3703_v6  ;;  %v3813_v11 = vpack.c.bf16 %v3265_v38, %v3271_v63 }
 0x186   : > { %2341 = vmatprep.subr.msk.bf16.mxu1 %vm3789_vm3, %v3803_v25  ;;  %2320 = vmatpush1.bf16.msk.msra.mxu0 %vm3804_vm7, %v2891_v30  ;;  %vm3811_vm3 = vnez %v3728_v61  ;;  %vm3812_vm7 = vnez %v3709_v10  ;;  %v2100_v30 = vld [vmem:[%s3580_s3 + $0x10] sm:$0xff] }
 0x187   : > { %2099 = vmatmul.mubr.msk.f32.vlgmr.msra.gmra.mrb[0].mxu1 %vm3805_vm14, %v2097_v32  ;;  %2323 = vmatprep.subr.msk.bf16.mxu0 %vm3806_vm0, %v3078_v45  ;;  %vm3810_vm0 = vnez %v3725_v39 }
 0x188   : > { %2344 = vmatpush1.bf16.msk.msra.mxu1 %vm3807_vm8, %v2945_v47  ;;  %1676 = vmatprep.mubr.f32.mxu0 %v3792_v9  ;;  %v1774_v47 = vpop.permute.xlu1 %1773 }
 0x189   : > { %2347 = vmatprep.subr.msk.bf16.mxu1 %vm3809_vm15, %v3808_v1  ;;  %1747 = vmatprep.mubr.f32.mxu1 %v3792_v9 }
 0x18a   : > { %2326 = vmatpush1.bf16.msk.msra.mxu0 %vm3810_vm0, %v3035_v21  ;;  %1788 = vperm.xlu0 %2565, %v1785_v41  }
 0x18b   : > { %2329 = vmatprep.subr.msk.bf16.mxu0 %vm3811_vm3, %v3177_v33  ;;  %v1941_v33 = vcombine.high %v1937_v49, %v1937_v49 }
 0x18c   : > { %2350 = vmatpush1.bf16.msk.msra.mxu1 %vm3812_vm7, %v3076_v44 }
 0x18d   : > { %2353 = vmatprep.subr.msk.bf16.mxu1 %vm3799_vm6, %v2351_v17 }
 0x18e   : > { %2332 = vmatpush1.bf16.msk.msra.mxu0 %vm3801_vm11, %v3129_v13 }
 0x18f   : > { %2335 = vmatprep.subr.msk.bf16.mxu0 %vm3188_vm2, %v3253_v23  ;;  %vm3814_vm2 = vmmov %vm3805_vm14 }
 0x190   : > { %2356 = vmatpush1.bf16.msk.msra.mxu1 %vm3800_vm4, %v3174_v2 }
 0x191   : > { %2359 = vmatprep.subr.msk.bf16.mxu1 %vm3245_vm10, %v3813_v11  ;;  %vm3816_vm10 = vnez %v3784_v20 }
 0x192   : > { %2338 = vmatpush1.bf16.msk.msra.mxu0 %vm3277_vm12, %v3251_v37  ;;  %vm3817_vm12 = vmmov %vm3814_vm2  ;;  %v1942_v37 = vcombine.high %v1938_v28, %v1938_v28 }
 0x193   : > { %2199 = vmatprep.subr.msk.mxu0 %vm3297_vm13, %v3332_v19 }
 0x194   : > { %2362 = vmatpush1.bf16.msk.msra.mxu1 %vm3257_vm9, %v3249_v24  ;;  %vm1791_vm9 = vcmask 64512  }
 0x195   : > { %2217 = vmatprep.subr.msk.mxu1 %vm3314_vm5, %v3371_v51 }
 0x196   : > { %2200 = vmatpush1.msk.msra.mxu0 %vm3361_vm1, %v3305_v15 }
 0x197   : > { %2101 = vmatmul.mubr.msk.f32.vlgmr.msra.gmra.mrb[0].mxu0 %vm3814_vm2, %v2100_v30 }
 0x198   : > { %2218 = vmatpush1.msk.msra.mxu1 %vm3816_vm10, %v3815_v31  ;;  %1859 = vmatprep.mubr.f32.mxu0 %v3792_v9 }
 0x199   : > { %2102 = vmatmul.mubr.msk.f32.vlgmr.msra.gmra.mrb[0].mxu1 %vm3817_vm12, %v2100_v30 }
 0x19a   : > { %1930 = vmatprep.mubr.f32.mxu1 %v3792_v9 }
 0x209   : > { %v1789_v35 = vpop.permute.xlu0 %1788 }
 0x26a   : > { %v1678_v48 = vpop.f32.mrb[0].mxu0 }
 0x26b   : > { %v1776_v56 = vadd.f32 %v1774_v47, %v1678_v48  ;;  %v1680_v6 = vpop.f32.mrb[1].mxu0 }
 0x26c   : > { %v1749_v10 = vpop.f32.mrb[0].mxu1  ;;  %v1777_v21 = vadd.f32 %v1774_v47, %v1680_v6 }
 0x26d   : > { %v1778_v27 = vadd.f32 %v1774_v47, %v1749_v10  ;;  %v1751_v39 = vpop.f32.mrb[1].mxu1  ;;  %v1780_v61 = vmax.f32 %v1776_v56, 0.0 }
 0x26e   : > { %v1779_v44 = vadd.f32 %v1774_v47, %v1751_v39  ;;  %v1781_v45 = vmax.f32 %v1777_v21, 0.0 }
 0x26f   : > { %v1782_v13 = vmax.f32 %v1778_v27, 0.0 }
 0x270   : > { %v1783_v5 = vmax.f32 %v1779_v44, 0.0  ;;  %1795 = vmatprep.subr.mxu0 %v1781_v45 }
 0x271   : > { %1796 = vmatpush1.msra.mxu0 %v1780_v61 }
 0x272   : > { %1866 = vmatprep.subr.mxu1 %v1783_v5  ;;  %2103 = vmatmul.mubr.msk.f32.vlgmr.msra.gmra.mrb[2].mxu0 %vm1791_vm9, %v1784_v18 }
 0x273   : > { %1867 = vmatpush1.msra.mxu1 %v1782_v13 }
 0x274   : > { %2104 = vmatmul.mubr.msk.f32.vlgmr.msra.gmra.mrb[2].mxu1 %vm1791_vm9, %v1784_v18 }
 0x345   : > { %v1861_v2 = vpop.f32.mrb[2].mxu0 }
 0x346   : > { %v1862_v58 = vadd.f32 %v1861_v2, %v1789_v35  ;;  %v1863_v24 = vpop.f32.mrb[3].mxu0 }
 0x347   : > { %v1932_v50 = vpop.f32.mrb[2].mxu1  ;;  %v1864_v34 = vadd.f32 %v1863_v24, %v1789_v35 }
 0x348   : > { %v1933_v23 = vadd.f32 %v1932_v50, %v1789_v35  ;;  %v1934_v38 = vpop.f32.mrb[3].mxu1  ;;  %v1945_v63 = vadd.f32 %v1937_v49, %v1862_v58 }
 0x349   : > { %v1935_v3 = vadd.f32 %v1934_v38, %v1789_v35  ;;  %v1946_v15 = vadd.f32 %v1941_v33, %v1864_v34 }
 0x34a   : > { %v1947_v26 = vadd.f32 %v1938_v28, %v1933_v23 }
 0x34b   : > { %v1948_v12 = vadd.f32 %v1942_v37, %v1935_v3  ;;  %v1953_v20 = vcombine.low %v1945_v63, %v1946_v15 }
 0x34d   : > { %v1954_v19 = vcombine.low %v1947_v26, %v1948_v12  ;;  %1957 = vst [vmem:[%s430_s10] sm:$0xff] %v1953_v20 }
 0x34f   : > { %1958 = vst [vmem:[%s430_s10 + $0x8] sm:$0xff] %v1954_v19 }
 0x350 PF: > { %s17_s26 = sadd.s32 1, %s2591_s26   ;;  %s3818_s24 = smov %s2587_s25 }
 0x351   : > { %p14_p5 = scmp.ge.s32.totalorder %s17_s26, 4   ;;  %s3819_s25 = smov %s3821_s27 }
 0x353   :  { %16 = sbr.rel (!%p14_p5) target bundleno = 2 (0x2), region = 87 }

</bundles_post_ra>
